<compile_context>
chip_gen: v7x
topology: tpu7x:2x2x1
jax: 0.10.0
libtpu: 0.0.40
codegen_flags: <defaults>
</compile_context>

<pallas_src>
import functools

import jax
import jax.numpy as jnp
from jax import lax
from jax.experimental import pallas as pl
from jax.experimental.pallas import tpu as pltpu


def _act(x, act):
    if act == "tanh":
        return jnp.tanh(x)
    return jnp.maximum(x, 0.0)  # relu


def fused_encoder_kernel(x_ref, ea_ref, src_ref, tgt_ref, invdeg_ref,
                         w1x1_ref, w1e1_ref, b11_ref, w2x1_ref, w2a1_ref,
                         w1x2_ref, w1e2_ref, b12_ref, w2x2_ref, w2a2_ref,
                         out_ref, *, k, act):
    """All k ResourceConv layers fused into one kernel invocation.

    x_ref      : (N, Pd)   padded node features (f32)
    ea_ref     : (E, Pe)   padded edge features (f32)
    src_ref    : (E, 1)    edge source indices j (int32)
    tgt_ref    : (1, E)    edge target indices i (int32)
    invdeg_ref : (N, 1)    1 / max(in-degree, 1) (f32)
    w1x*/w1e*/b1*          message Linear (split by input, zero-padded; W bf16)
    w2x*/w2a*              update Linear (no bias, split by input; bf16)
    out_ref    : (N, Po)   (N, E, Pd, Pe, Po all multiples of 128)
    """
    x = x_ref[...]                              # (N, Pd) f32
    ea = ea_ref[...].astype(jnp.bfloat16)       # (E, Pe) bf16 for MXU
    src = src_ref[...]                          # (E, 1)
    tgt = tgt_ref[...]                          # (1, E)
    inv_deg = invdeg_ref[...]                   # (N, 1) f32

    N = x.shape[0]
    E = ea.shape[0]

    # Layer-invariant one-hot gather / scatter matrices, built directly in
    # bf16 (0/1 values are exact) -- no transient f32 E*N intermediate.
    gather_oh = (lax.broadcasted_iota(jnp.int32, (E, N), 1) == src
                 ).astype(jnp.bfloat16)         # (E, N)
    scatter_oh = (lax.broadcasted_iota(jnp.int32, (N, E), 0) == tgt
                  ).astype(jnp.bfloat16)        # (N, E); tgt pad == N => all-0 col

    def conv(x_in, w1x, w2x, w2a, e_term):
        xb = x_in.astype(jnp.bfloat16)
        # message: act(x_j @ W1x + ea @ W1e + b1); gather folded after the
        # projection:  G @ (x @ W1x) == (G @ x) @ W1x.
        xw = jnp.dot(xb, w1x, preferred_element_type=jnp.float32)          # (N, Po)
        xjw = jnp.dot(gather_oh, xw.astype(jnp.bfloat16),
                      preferred_element_type=jnp.float32)                  # (E, Po)
        msg = _act(xjw + e_term, act)                                      # (E, Po)
        # mean aggregation by target node (bf16 MXU, f32 accumulate).
        agg = jnp.dot(scatter_oh, msg.astype(jnp.bfloat16),
                      preferred_element_type=jnp.float32) * inv_deg        # (N, Po)
        # update: act([x, agg] @ W2), no bias.
        upd = (jnp.dot(xb, w2x, preferred_element_type=jnp.float32)
               + jnp.dot(agg.astype(jnp.bfloat16), w2a,
                         preferred_element_type=jnp.float32))
        return _act(upd, act)

    # conv1 (its edge term is computed exactly once).
    e_term1 = (jnp.dot(ea, w1e1_ref[...], preferred_element_type=jnp.float32)
               + b11_ref[...])
    x = conv(x, w1x1_ref[...], w2x1_ref[...], w2a1_ref[...], e_term1)

    # conv2 applied (k - 1) times; edge term and weights loaded once, reused.
    if k > 1:
        e_term2 = (jnp.dot(ea, w1e2_ref[...], preferred_element_type=jnp.float32)
                   + b12_ref[...])
        w1x2 = w1x2_ref[...]
        w2x2 = w2x2_ref[...]
        w2a2 = w2a2_ref[...]
        if k - 1 <= 4:
            # Short stacks: static unroll keeps the full schedule visible.
            for _ in range(k - 1):
                x = conv(x, w1x2, w2x2, w2a2, e_term2)
        else:
            # Deep stacks: real loop bounds live ranges and compile time.
            x = lax.fori_loop(
                0, k - 1,
                lambda _, xc: conv(xc, w1x2, w2x2, w2a2, e_term2), x)

    out_ref[...] = x


def _round_up(v, m):
    return -(-v // m) * m


def _pad2(a, rows, cols):
    return jnp.pad(a, ((0, rows - a.shape[0]), (0, cols - a.shape[1])))


def _pad_conv_params(p, pin, pe, po):
    # Matmul weights pre-cast to bf16 (MXU rate); bias stays f32 (added post-acc).
    return {
        "w1x": _pad2(p["w1x"], pin, po).astype(jnp.bfloat16),
        "w1e": _pad2(p["w1e"], pe, po).astype(jnp.bfloat16),
        "b1": _pad2(p["b1"], 1, po),
        "w2x": _pad2(p["w2x"], pin, po).astype(jnp.bfloat16),
        "w2a": _pad2(p["w2a"], po, po).astype(jnp.bfloat16),
    }


def _vmem_limit_bytes():
    # Generation-aware scoped-VMEM limit: ~7/8 of physical, capped at 112 MiB.
    try:
        cap = int(pltpu.get_tpu_info().vmem_capacity_bytes)
    except Exception:
        cap = 128 * 1024 * 1024
    return int(max(32 * 1024 * 1024, min(cap - cap // 8, 112 * 1024 * 1024)))


def init_conv_params(key, in_dim, edge_dim, out_dim):
    """Synthetic weights matching the PyTorch layer shapes (nn.Linear init).

    nn.Linear(in_dim+edge_dim, out_dim)            -> w1x/w1e (+ b1)
    nn.Linear(in_dim+out_dim, out_dim, bias=False) -> w2x/w2a
    Stored transposed so the kernel computes x @ W.
    """
    k1, k2, k3 = jax.random.split(key, 3)
    bound1 = 1.0 / jnp.sqrt(in_dim + edge_dim)
    w1 = jax.random.uniform(k1, (in_dim + edge_dim, out_dim),
                            minval=-bound1, maxval=bound1, dtype=jnp.float32)
    b1 = jax.random.uniform(k2, (1, out_dim),
                            minval=-bound1, maxval=bound1, dtype=jnp.float32)
    bound2 = 1.0 / jnp.sqrt(in_dim + out_dim)
    w2 = jax.random.uniform(k3, (in_dim + out_dim, out_dim),
                            minval=-bound2, maxval=bound2, dtype=jnp.float32)
    return {
        "w1x": w1[:in_dim],       # (in_dim, out_dim)
        "w1e": w1[in_dim:],       # (edge_dim, out_dim)
        "b1": b1,                 # (1, out_dim)
        "w2x": w2[:in_dim],       # (in_dim, out_dim)
        "w2a": w2[in_dim:],       # (out_dim, out_dim)
    }


@functools.partial(jax.jit, static_argnames=("k", "act"))
def resource_encoder(x, edge_index, edge_attr, params, k, act="relu"):
    """x: (N, in_dim) f32; edge_index: (2, E) int; edge_attr: (E, edge_dim) f32."""
    N, in_dim = x.shape
    E, edge_dim = edge_attr.shape
    out_dim = params["conv1"]["w1x"].shape[1]

    # Pad every matmul-participating dim to a multiple of 128: feature dims are
    # lane dims of the projections; N and E are lane AND contraction dims of
    # the one-hot gather/scatter matmuls (and sublane dims of bf16 operands).
    pd = _round_up(in_dim, 128)
    pe = _round_up(edge_dim, 128)
    po = _round_up(out_dim, 128)
    np_ = _round_up(N, 128)
    ep = _round_up(E, 128)

    x_p = _pad2(x.astype(jnp.float32), np_, pd)
    ea_p = _pad2(edge_attr.astype(jnp.float32), ep, pe)

    src = edge_index[0].astype(jnp.int32)
    tgt = edge_index[1].astype(jnp.int32)
    # Padded edges: src -> node 0 (harmless, never scattered); tgt -> np_.
    # INVARIANT: the tgt pad value must equal the PADDED node count so padded
    # edges match no scatter row and contribute nothing to any aggregate.
    src_p = jnp.pad(src, (0, ep - E), constant_values=0).reshape(ep, 1)
    tgt_p = jnp.pad(tgt, (0, ep - E), constant_values=np_).reshape(1, ep)

    # 1/deg depends only on edge_index -> compute once, reuse across layers.
    # (Padded / isolated nodes: deg=0 -> inv_deg=1, agg row is all-zero anyway.)
    deg = jnp.zeros((np_,), jnp.float32).at[tgt].add(1.0)
    inv_deg = (1.0 / jnp.maximum(deg, 1.0)).reshape(np_, 1)

    c1 = _pad_conv_params(params["conv1"], pd, pe, po)
    c2 = _pad_conv_params(params["conv2"], po, pe, po)
    weights = [c1["w1x"], c1["w1e"], c1["b1"], c1["w2x"], c1["w2a"],
               c2["w1x"], c2["w1e"], c2["b1"], c2["w2x"], c2["w2a"]]

    # Advisory cost estimate so XLA schedules the custom call sensibly.
    def conv_flops(pin):
        return 2 * (np_ * pin * po + ep * np_ * po + np_ * ep * po
                    + np_ * pin * po + np_ * po * po)
    flops = conv_flops(pd) + (k - 1) * conv_flops(po)
    flops += 2 * ep * pe * po * (2 if k > 1 else 1)
    transcendentals = k * (ep * po + np_ * po) if act == "tanh" else 0
    bytes_accessed = (4 * (int(x_p.size) + int(ea_p.size) + int(src_p.size)
                           + int(tgt_p.size) + int(inv_deg.size) + np_ * po)
                      + sum(int(w.size) * w.dtype.itemsize for w in weights))

    kernel = functools.partial(fused_encoder_kernel, k=k, act=act)
    vmem = pl.BlockSpec(memory_space=pltpu.MemorySpace.VMEM)
    out = pl.pallas_call(
        kernel,
        out_shape=jax.ShapeDtypeStruct((np_, po), jnp.float32),
        in_specs=[vmem] * 15,
        out_specs=vmem,
        compiler_params=pltpu.CompilerParams(
            vmem_limit_bytes=_vmem_limit_bytes()),
        cost_estimate=pl.CostEstimate(flops=int(flops),
                                      transcendentals=int(transcendentals),
                                      bytes_accessed=int(bytes_accessed)),
    )(x_p, ea_p, src_p, tgt_p, inv_deg, *weights)

    return out[:N, :out_dim]


if __name__ == "__main__":
    key = jax.random.PRNGKey(0)
    k_x, k_ea, k_ei, k_p1, k_p2 = jax.random.split(key, 5)

    # Small synthetic graph.
    N, E = 8, 16
    in_dim, edge_dim, out_dim, K = 8, 4, 16, 3

    x = jax.random.normal(k_x, (N, in_dim), dtype=jnp.float32)
    edge_attr = jax.random.normal(k_ea, (E, edge_dim), dtype=jnp.float32)
    edge_index = jax.random.randint(k_ei, (2, E), 0, N, dtype=jnp.int32)

    params = {
        "conv1": init_conv_params(k_p1, in_dim, edge_dim, out_dim),
        "conv2": init_conv_params(k_p2, out_dim, edge_dim, out_dim),
    }

    out = resource_encoder(x, edge_index, edge_attr, params, k=K, act="relu")
    out = jax.block_until_ready(out)
    assert out.shape == (N, out_dim), out.shape
    assert bool(jnp.all(jnp.isfinite(out)))
    print("KERNEL_OK")
</pallas_src>

<mosaic_0001>
module attributes {stable_mosaic.version = 11 : i64} {
  func.func private @main(%arg0: i32) attributes {dimension_semantics = [#tpu.dimension_semantics<core_parallel>], iteration_bounds = array<i64: 2>, tpu.core_type = #tpu.core_type<sc_scalar_subcore>, window_params = []} {
    return
  }
}

module attributes {stable_mosaic.version = 11 : i64} {
  func.func private @main(%arg0: i32) attributes {dimension_semantics = [#tpu.dimension_semantics<core_parallel>], iteration_bounds = array<i64: 2>, tpu.core_type = #tpu.core_type<sc_scalar_subcore>, window_params = []} {
    return
  }
}

module attributes {stable_mosaic.version = 11 : i64} {
  func.func @fused_encoder_kernel(%arg0: memref<128x128xf32, #tpu.memory_space<vmem>>, %arg1: memref<128x128xf32, #tpu.memory_space<vmem>>, %arg2: memref<128x1xi32, #tpu.memory_space<vmem>>, %arg3: memref<1x128xi32, #tpu.memory_space<vmem>>, %arg4: memref<128x1xf32, #tpu.memory_space<vmem>>, %arg5: memref<128x128xbf16, #tpu.memory_space<vmem>>, %arg6: memref<128x128xbf16, #tpu.memory_space<vmem>>, %arg7: memref<1x128xf32, #tpu.memory_space<vmem>>, %arg8: memref<128x128xbf16, #tpu.memory_space<vmem>>, %arg9: memref<128x128xbf16, #tpu.memory_space<vmem>>, %arg10: memref<128x128xbf16, #tpu.memory_space<vmem>>, %arg11: memref<128x128xbf16, #tpu.memory_space<vmem>>, %arg12: memref<1x128xf32, #tpu.memory_space<vmem>>, %arg13: memref<128x128xbf16, #tpu.memory_space<vmem>>, %arg14: memref<128x128xbf16, #tpu.memory_space<vmem>>, %arg15: memref<128x128xf32, #tpu.memory_space<vmem>>) attributes {dimension_semantics = [], scalar_prefetch = 0 : i64, scratch_operands = 0 : i64, tpu.core_type = #tpu.core_type<tc>} {
    %c0 = arith.constant 0 : index
    %c0_0 = arith.constant 0 : index
    %0 = vector.load %arg0[%c0, %c0_0] : memref<128x128xf32, #tpu.memory_space<vmem>>, vector<128x128xf32>
    %c0_1 = arith.constant 0 : index
    %c0_2 = arith.constant 0 : index
    %1 = vector.load %arg1[%c0_1, %c0_2] : memref<128x128xf32, #tpu.memory_space<vmem>>, vector<128x128xf32>
    %2 = arith.truncf %1 : vector<128x128xf32> to vector<128x128xbf16>
    %c0_3 = arith.constant 0 : index
    %c0_4 = arith.constant 0 : index
    %3 = vector.load %arg2[%c0_3, %c0_4] : memref<128x1xi32, #tpu.memory_space<vmem>>, vector<128x1xi32>
    %c0_5 = arith.constant 0 : index
    %c0_6 = arith.constant 0 : index
    %4 = vector.load %arg3[%c0_5, %c0_6] : memref<1x128xi32, #tpu.memory_space<vmem>>, vector<1x128xi32>
    %c0_7 = arith.constant 0 : index
    %c0_8 = arith.constant 0 : index
    %5 = vector.load %arg4[%c0_7, %c0_8] : memref<128x1xf32, #tpu.memory_space<vmem>>, vector<128x1xf32>
    %6 = tpu.iota {dimensions = array<i32: 1>} : vector<128x128xi32>
    %7 = vector.broadcast %3 : vector<128x1xi32> to vector<128x128xi32>
    %8 = arith.cmpi eq, %6, %7 : vector<128x128xi32>
    %9 = arith.extui %8 : vector<128x128xi1> to vector<128x128xi32>
    %10 = arith.sitofp %9 : vector<128x128xi32> to vector<128x128xf32>
    %11 = arith.truncf %10 : vector<128x128xf32> to vector<128x128xbf16>
    %12 = tpu.iota {dimensions = array<i32: 0>} : vector<128x128xi32>
    %13 = vector.broadcast %4 : vector<1x128xi32> to vector<128x128xi32>
    %14 = arith.cmpi eq, %12, %13 : vector<128x128xi32>
    %15 = arith.extui %14 : vector<128x128xi1> to vector<128x128xi32>
    %16 = arith.sitofp %15 : vector<128x128xi32> to vector<128x128xf32>
    %17 = arith.truncf %16 : vector<128x128xf32> to vector<128x128xbf16>
    %c0_9 = arith.constant 0 : index
    %c0_10 = arith.constant 0 : index
    %18 = vector.load %arg6[%c0_9, %c0_10] : memref<128x128xbf16, #tpu.memory_space<vmem>>, vector<128x128xbf16>
    %cst = arith.constant dense<0.000000e+00> : vector<128x128xf32>
    %19 = tpu.matmul %2, %18, %cst {dimension_numbers = #tpu.dot_dimension_numbers<[1], [0], [0], [1], [0, 0, 1, 1], [], []>} : vector<128x128xbf16>, vector<128x128xbf16>, vector<128x128xf32> -> vector<128x128xf32>
    %c0_11 = arith.constant 0 : index
    %c0_12 = arith.constant 0 : index
    %20 = vector.load %arg7[%c0_11, %c0_12] : memref<1x128xf32, #tpu.memory_space<vmem>>, vector<1x128xf32>
    %21 = vector.broadcast %20 : vector<1x128xf32> to vector<128x128xf32>
    %22 = arith.addf %19, %21 : vector<128x128xf32>
    %c0_13 = arith.constant 0 : index
    %c0_14 = arith.constant 0 : index
    %23 = vector.load %arg5[%c0_13, %c0_14] : memref<128x128xbf16, #tpu.memory_space<vmem>>, vector<128x128xbf16>
    %c0_15 = arith.constant 0 : index
    %c0_16 = arith.constant 0 : index
    %24 = vector.load %arg8[%c0_15, %c0_16] : memref<128x128xbf16, #tpu.memory_space<vmem>>, vector<128x128xbf16>
    %c0_17 = arith.constant 0 : index
    %c0_18 = arith.constant 0 : index
    %25 = vector.load %arg9[%c0_17, %c0_18] : memref<128x128xbf16, #tpu.memory_space<vmem>>, vector<128x128xbf16>
    %26 = arith.truncf %0 : vector<128x128xf32> to vector<128x128xbf16>
    %cst_19 = arith.constant dense<0.000000e+00> : vector<128x128xf32>
    %27 = tpu.matmul %26, %23, %cst_19 {dimension_numbers = #tpu.dot_dimension_numbers<[1], [0], [0], [1], [0, 0, 1, 1], [], []>} : vector<128x128xbf16>, vector<128x128xbf16>, vector<128x128xf32> -> vector<128x128xf32>
    %28 = arith.truncf %27 : vector<128x128xf32> to vector<128x128xbf16>
    %cst_20 = arith.constant dense<0.000000e+00> : vector<128x128xf32>
    %29 = tpu.matmul %11, %28, %cst_20 {dimension_numbers = #tpu.dot_dimension_numbers<[1], [0], [0], [1], [0, 0, 1, 1], [], []>} : vector<128x128xbf16>, vector<128x128xbf16>, vector<128x128xf32> -> vector<128x128xf32>
    %30 = arith.addf %29, %22 : vector<128x128xf32>
    %cst_21 = arith.constant 0.000000e+00 : f32
    %31 = vector.broadcast %cst_21 : f32 to vector<128x128xf32>
    %32 = arith.maximumf %30, %31 : vector<128x128xf32>
    %33 = arith.truncf %32 : vector<128x128xf32> to vector<128x128xbf16>
    %cst_22 = arith.constant dense<0.000000e+00> : vector<128x128xf32>
    %34 = tpu.matmul %17, %33, %cst_22 {dimension_numbers = #tpu.dot_dimension_numbers<[1], [0], [0], [1], [0, 0, 1, 1], [], []>} : vector<128x128xbf16>, vector<128x128xbf16>, vector<128x128xf32> -> vector<128x128xf32>
    %35 = vector.broadcast %5 : vector<128x1xf32> to vector<128x128xf32>
    %36 = arith.mulf %34, %35 : vector<128x128xf32>
    %cst_23 = arith.constant dense<0.000000e+00> : vector<128x128xf32>
    %37 = tpu.matmul %26, %24, %cst_23 {dimension_numbers = #tpu.dot_dimension_numbers<[1], [0], [0], [1], [0, 0, 1, 1], [], []>} : vector<128x128xbf16>, vector<128x128xbf16>, vector<128x128xf32> -> vector<128x128xf32>
    %38 = arith.truncf %36 : vector<128x128xf32> to vector<128x128xbf16>
    %cst_24 = arith.constant dense<0.000000e+00> : vector<128x128xf32>
    %39 = tpu.matmul %38, %25, %cst_24 {dimension_numbers = #tpu.dot_dimension_numbers<[1], [0], [0], [1], [0, 0, 1, 1], [], []>} : vector<128x128xbf16>, vector<128x128xbf16>, vector<128x128xf32> -> vector<128x128xf32>
    %40 = arith.addf %37, %39 : vector<128x128xf32>
    %cst_25 = arith.constant 0.000000e+00 : f32
    %41 = vector.broadcast %cst_25 : f32 to vector<128x128xf32>
    %42 = arith.maximumf %40, %41 : vector<128x128xf32>
    %c0_26 = arith.constant 0 : index
    %c0_27 = arith.constant 0 : index
    %43 = vector.load %arg11[%c0_26, %c0_27] : memref<128x128xbf16, #tpu.memory_space<vmem>>, vector<128x128xbf16>
    %cst_28 = arith.constant dense<0.000000e+00> : vector<128x128xf32>
    %44 = tpu.matmul %2, %43, %cst_28 {dimension_numbers = #tpu.dot_dimension_numbers<[1], [0], [0], [1], [0, 0, 1, 1], [], []>} : vector<128x128xbf16>, vector<128x128xbf16>, vector<128x128xf32> -> vector<128x128xf32>
    %c0_29 = arith.constant 0 : index
    %c0_30 = arith.constant 0 : index
    %45 = vector.load %arg12[%c0_29, %c0_30] : memref<1x128xf32, #tpu.memory_space<vmem>>, vector<1x128xf32>
    %46 = vector.broadcast %45 : vector<1x128xf32> to vector<128x128xf32>
    %47 = arith.addf %44, %46 : vector<128x128xf32>
    %c0_31 = arith.constant 0 : index
    %c0_32 = arith.constant 0 : index
    %48 = vector.load %arg10[%c0_31, %c0_32] : memref<128x128xbf16, #tpu.memory_space<vmem>>, vector<128x128xbf16>
    %c0_33 = arith.constant 0 : index
    %c0_34 = arith.constant 0 : index
    %49 = vector.load %arg13[%c0_33, %c0_34] : memref<128x128xbf16, #tpu.memory_space<vmem>>, vector<128x128xbf16>
    %c0_35 = arith.constant 0 : index
    %c0_36 = arith.constant 0 : index
    %50 = vector.load %arg14[%c0_35, %c0_36] : memref<128x128xbf16, #tpu.memory_space<vmem>>, vector<128x128xbf16>
    %51 = arith.truncf %42 : vector<128x128xf32> to vector<128x128xbf16>
    %cst_37 = arith.constant dense<0.000000e+00> : vector<128x128xf32>
    %52 = tpu.matmul %51, %48, %cst_37 {dimension_numbers = #tpu.dot_dimension_numbers<[1], [0], [0], [1], [0, 0, 1, 1], [], []>} : vector<128x128xbf16>, vector<128x128xbf16>, vector<128x128xf32> -> vector<128x128xf32>
    %53 = arith.truncf %52 : vector<128x128xf32> to vector<128x128xbf16>
    %cst_38 = arith.constant dense<0.000000e+00> : vector<128x128xf32>
    %54 = tpu.matmul %11, %53, %cst_38 {dimension_numbers = #tpu.dot_dimension_numbers<[1], [0], [0], [1], [0, 0, 1, 1], [], []>} : vector<128x128xbf16>, vector<128x128xbf16>, vector<128x128xf32> -> vector<128x128xf32>
    %55 = arith.addf %54, %47 : vector<128x128xf32>
    %cst_39 = arith.constant 0.000000e+00 : f32
    %56 = vector.broadcast %cst_39 : f32 to vector<128x128xf32>
    %57 = arith.maximumf %55, %56 : vector<128x128xf32>
    %58 = arith.truncf %57 : vector<128x128xf32> to vector<128x128xbf16>
    %cst_40 = arith.constant dense<0.000000e+00> : vector<128x128xf32>
    %59 = tpu.matmul %17, %58, %cst_40 {dimension_numbers = #tpu.dot_dimension_numbers<[1], [0], [0], [1], [0, 0, 1, 1], [], []>} : vector<128x128xbf16>, vector<128x128xbf16>, vector<128x128xf32> -> vector<128x128xf32>
    %60 = vector.broadcast %5 : vector<128x1xf32> to vector<128x128xf32>
    %61 = arith.mulf %59, %60 : vector<128x128xf32>
    %cst_41 = arith.constant dense<0.000000e+00> : vector<128x128xf32>
    %62 = tpu.matmul %51, %49, %cst_41 {dimension_numbers = #tpu.dot_dimension_numbers<[1], [0], [0], [1], [0, 0, 1, 1], [], []>} : vector<128x128xbf16>, vector<128x128xbf16>, vector<128x128xf32> -> vector<128x128xf32>
    %63 = arith.truncf %61 : vector<128x128xf32> to vector<128x128xbf16>
    %cst_42 = arith.constant dense<0.000000e+00> : vector<128x128xf32>
    %64 = tpu.matmul %63, %50, %cst_42 {dimension_numbers = #tpu.dot_dimension_numbers<[1], [0], [0], [1], [0, 0, 1, 1], [], []>} : vector<128x128xbf16>, vector<128x128xbf16>, vector<128x128xf32> -> vector<128x128xf32>
    %65 = arith.addf %62, %64 : vector<128x128xf32>
    %cst_43 = arith.constant 0.000000e+00 : f32
    %66 = vector.broadcast %cst_43 : f32 to vector<128x128xf32>
    %67 = arith.maximumf %65, %66 : vector<128x128xf32>
    %68 = arith.truncf %67 : vector<128x128xf32> to vector<128x128xbf16>
    %cst_44 = arith.constant dense<0.000000e+00> : vector<128x128xf32>
    %69 = tpu.matmul %68, %48, %cst_44 {dimension_numbers = #tpu.dot_dimension_numbers<[1], [0], [0], [1], [0, 0, 1, 1], [], []>} : vector<128x128xbf16>, vector<128x128xbf16>, vector<128x128xf32> -> vector<128x128xf32>
    %70 = arith.truncf %69 : vector<128x128xf32> to vector<128x128xbf16>
    %cst_45 = arith.constant dense<0.000000e+00> : vector<128x128xf32>
    %71 = tpu.matmul %11, %70, %cst_45 {dimension_numbers = #tpu.dot_dimension_numbers<[1], [0], [0], [1], [0, 0, 1, 1], [], []>} : vector<128x128xbf16>, vector<128x128xbf16>, vector<128x128xf32> -> vector<128x128xf32>
    %72 = arith.addf %71, %47 : vector<128x128xf32>
    %cst_46 = arith.constant 0.000000e+00 : f32
    %73 = vector.broadcast %cst_46 : f32 to vector<128x128xf32>
    %74 = arith.maximumf %72, %73 : vector<128x128xf32>
    %75 = arith.truncf %74 : vector<128x128xf32> to vector<128x128xbf16>
    %cst_47 = arith.constant dense<0.000000e+00> : vector<128x128xf32>
    %76 = tpu.matmul %17, %75, %cst_47 {dimension_numbers = #tpu.dot_dimension_numbers<[1], [0], [0], [1], [0, 0, 1, 1], [], []>} : vector<128x128xbf16>, vector<128x128xbf16>, vector<128x128xf32> -> vector<128x128xf32>
    %77 = vector.broadcast %5 : vector<128x1xf32> to vector<128x128xf32>
    %78 = arith.mulf %76, %77 : vector<128x128xf32>
    %cst_48 = arith.constant dense<0.000000e+00> : vector<128x128xf32>
    %79 = tpu.matmul %68, %49, %cst_48 {dimension_numbers = #tpu.dot_dimension_numbers<[1], [0], [0], [1], [0, 0, 1, 1], [], []>} : vector<128x128xbf16>, vector<128x128xbf16>, vector<128x128xf32> -> vector<128x128xf32>
    %80 = arith.truncf %78 : vector<128x128xf32> to vector<128x128xbf16>
    %cst_49 = arith.constant dense<0.000000e+00> : vector<128x128xf32>
    %81 = tpu.matmul %80, %50, %cst_49 {dimension_numbers = #tpu.dot_dimension_numbers<[1], [0], [0], [1], [0, 0, 1, 1], [], []>} : vector<128x128xbf16>, vector<128x128xbf16>, vector<128x128xf32> -> vector<128x128xf32>
    %82 = arith.addf %79, %81 : vector<128x128xf32>
    %cst_50 = arith.constant 0.000000e+00 : f32
    %83 = vector.broadcast %cst_50 : f32 to vector<128x128xf32>
    %84 = arith.maximumf %82, %83 : vector<128x128xf32>
    %c0_51 = arith.constant 0 : index
    %c0_52 = arith.constant 0 : index
    %85 = vector.load %arg15[%c0_51, %c0_52] : memref<128x128xf32, #tpu.memory_space<vmem>>, vector<128x128xf32>
    tpu.vector_store %arg15[%c0_51, %c0_52], %84 {strides = array<i32>} : memref<128x128xf32, #tpu.memory_space<vmem>>, vector<128x128xf32>,
    return
  }
}

</mosaic_0001>

<bundles_post_ra>
// kernel: resource_encoder.1
= control target key start
LH: loop header
LB: loop body
LE: loop exit
PB: predicated region body
PF: predicated region fallthrough
CT: control target
= control target key end

     0   :  { %20 = vsyncpa [#allocation3], 0  ;;  %s5676_s0 = inlined_call_operand.hbm [shape: f32[128,128], index: 0, kind: input, shape index: {}]   ;;  %s5677_s1 = inlined_call_operand.hbm [shape: f32[128,128], index: 1, kind: input, shape index: {}]   ;;  %s5678_s2 = inlined_call_operand.hbm [shape: s32[128,1], index: 2, kind: input, shape index: {}]   ;;  %s5679_s3 = inlined_call_operand.hbm [shape: s32[1,128], index: 3, kind: input, shape index: {}]   ;;  %s5680_s4 = inlined_call_operand.hbm [shape: f32[128,1], index: 4, kind: input, shape index: {}]   ;;  %s5681_s5 = inlined_call_operand.hbm [shape: bf16[128,128], index: 5, kind: input, shape index: {}]   ;;  %s5682_s6 = inlined_call_operand.hbm [shape: bf16[128,128], index: 6, kind: input, shape index: {}]   ;;  %s5683_s7 = inlined_call_operand.hbm [shape: f32[1,128], index: 7, kind: input, shape index: {}]   ;;  %s5684_s8 = inlined_call_operand.hbm [shape: bf16[128,128], index: 8, kind: input, shape index: {}]   ;;  %s5685_s9 = inlined_call_operand.hbm [shape: bf16[128,128], index: 9, kind: input, shape index: {}]   ;;  %s5686_s10 = inlined_call_operand.hbm [shape: bf16[128,128], index: 10, kind: input, shape index: {}]   ;;  %s5687_s11 = inlined_call_operand.hbm [shape: bf16[128,128], index: 11, kind: input, shape index: {}]   ;;  %s5688_s12 = inlined_call_operand.hbm [shape: f32[1,128], index: 12, kind: input, shape index: {}]   ;;  %s5689_s13 = inlined_call_operand.hbm [shape: bf16[128,128], index: 13, kind: input, shape index: {}]   ;;  %s5690_s14 = inlined_call_operand.hbm [shape: bf16[128,128], index: 14, kind: input, shape index: {}]   ;;  %s5691_s15 = inlined_call_operand.hbm [shape: f32[128,128], index: 15, kind: output, shape index: {}]  }
   0x1   :  { %21 = vsyncpa [#allocation6], 0 }
   0x2   :  { %22 = vsyncpa [#allocation9], 0 }
   0x3   :  { %23 = vsyncpa [#allocation12], 0 }
   0x4   :  { %24 = vsyncpa [#allocation15], 0 }
   0x5   :  { %25 = vsyncpa [#allocation18], 0 }
   0x6   :  { %26 = vsyncpa [#allocation21], 0 }
   0x7   :  { %27 = vsyncpa [#allocation24], 0 }
   0x8   :  { %28 = vsyncpa [#allocation4], 0  ;;  %s4605_s18 = smov [#allocation5]   ;;  %s4606_s20 = smov [#allocation8]  }
   0x9   :  { %s46_s19 = sshll.u32 %s4605_s18, 4  ;;  %s71_s21 = sshll.u32 %s4606_s20, 4  ;;  %s47_s19 = int_to_ptr.vmem [resolvable:$true] %s46_s19  ;;  %s4707_s21 = int_to_ptr.vmem [resolvable:$true] %s71_s21 }
   0xa   :  { %s4235_s24 = scalar_lea.hbm %s5677_s1, 2048 }
   0xb   :  { %p4236_p0 = scmp.ne.s32.totalorder %s5677_s1, %s4235_s24  ;;  %p4239_p1 = scmp.lt.u32.totalorder %s4235_s24, %s5677_s1 }
   0xd   :  { %p4241_p2 = pnand %p4239_p1, %p4236_p0 }
   0xf   :  { %4244 = shalt.err (!%p4241_p2)
}
  0x10   :  { %s4245_s29 = scalar_lea.vmem %s47_s19, 2048  ;;  %p4250_p4 = scmp.lt.s32.totalorder %s47_s19, %s47_s19 }
  0x11   :  { %p4246_p3 = scmp.ne.s32.totalorder %s47_s19, %s4245_s29  ;;  %p4251_p5 = scmp.lt.s32.totalorder %s4245_s29, %s4245_s29 }
  0x13   :  { %p4252_p6 = por %p4251_p5, %p4250_p4 }
  0x15   :  { %p4253_p7 = pnand %p4252_p6, %p4246_p3 }
  0x17   :  { %4256 = shalt.err (!%p4253_p7)
}
  0x18   :  { %s5692_s30 = smov 128   ;;  %s4608_s16 = smov 8  }
  0x19   :  { %52 = dma.hbm_to_vmem [thread:$0]  %s5677_s1, 2048, %s47_s19, [#allocation6], %s5692_s30, %s5692_s30, %s4608_s16  }
  0x1a   :  { %s4257_s23 = scalar_lea.hbm %s5679_s3, 16 }
  0x1b   :  { %p4258_p8 = scmp.ne.s32.totalorder %s5679_s3, %s4257_s23  ;;  %p4261_p9 = scmp.lt.u32.totalorder %s4257_s23, %s5679_s3 }
  0x1d   :  { %p4263_p10 = pnand %p4261_p9, %p4258_p8 }
  0x1f   :  { %4266 = shalt.err (!%p4263_p10)
}
  0x20   :  { %s4267_s28 = scalar_lea.vmem %s4707_s21, 16  ;;  %s4271_s1 = scalar_lea.vmem %s4707_s21, 32 }
  0x21   :  { %p4268_p11 = scmp.ne.s32.totalorder %s4707_s21, %s4267_s28  ;;  %p4272_p12 = scmp.lt.s32.totalorder %s4707_s21, %s4707_s21 }
  0x22   :  { %p4273_p13 = scmp.lt.s32.totalorder %s4271_s1, %s4267_s28 }
  0x24   :  { %p4274_p0 = por %p4273_p13, %p4272_p12 }
  0x26   :  { %p4275_p1 = pnand %p4274_p0, %p4268_p11 }
  0x28   :  { %4278 = shalt.err (!%p4275_p1)
}
  0x29   :  { %74 = dma.hbm_to_vmem [thread:$0]  %s5679_s3, 16, %s4707_s21, [#allocation9]  }
  0x2a   :  { %s4609_s17 = smov [#allocation11]   ;;  %s4279_s23 = scalar_lea.hbm %s5681_s5, 1024 }
  0x2b   :  { %s92_s18 = sshll.u32 %s4609_s17, 4  ;;  %p4280_p2 = scmp.ne.s32.totalorder %s5681_s5, %s4279_s23  ;;  %s93_s18 = int_to_ptr.vmem [resolvable:$true] %s92_s18 }
  0x2c   :  { %p4283_p3 = scmp.lt.u32.totalorder %s4279_s23, %s5681_s5 }
  0x2e   :  { %p4285_p4 = pnand %p4283_p3, %p4280_p2 }
  0x30   :  { %4288 = shalt.err (!%p4285_p4)
}
  0x31   :  { %s4289_s28 = scalar_lea.vmem %s93_s18, 1024  ;;  %p4294_p6 = scmp.lt.s32.totalorder %s93_s18, %s93_s18 }
  0x32   :  { %p4290_p5 = scmp.ne.s32.totalorder %s93_s18, %s4289_s28  ;;  %p4295_p7 = scmp.lt.s32.totalorder %s4289_s28, %s4289_s28 }
  0x34   :  { %p4296_p8 = por %p4295_p7, %p4294_p6 }
  0x36   :  { %p4297_p9 = pnand %p4296_p8, %p4290_p5 }
  0x38   :  { %4300 = shalt.err (!%p4297_p9)
}
  0x39   :  { %s4610_s3 = smov 64   ;;  %s4611_s21 = smov 4  }
  0x3a   :  { %98 = dma.hbm_to_vmem [thread:$0]  %s5681_s5, 1024, %s93_s18, [#allocation12], %s4610_s3, %s4610_s3, %s4611_s21  }
  0x3b   :  { %s4612_s29 = smov [#allocation14]   ;;  %s4613_s20 = smov [#allocation17]  }
  0x3c   :  { %s117_s17 = sshll.u32 %s4612_s29, 4  ;;  %s138_s22 = sshll.u32 %s4613_s20, 4  ;;  %s118_s17 = int_to_ptr.vmem [resolvable:$true] %s117_s17  ;;  %s139_s22 = int_to_ptr.vmem [resolvable:$true] %s138_s22 }
  0x3d   :  { %s4301_s25 = scalar_lea.hbm %s5683_s7, 16 }
  0x3e   :  { %p4302_p10 = scmp.ne.s32.totalorder %s5683_s7, %s4301_s25  ;;  %p4305_p11 = scmp.lt.u32.totalorder %s4301_s25, %s5683_s7 }
  0x40   :  { %p4307_p12 = pnand %p4305_p11, %p4302_p10 }
  0x42   :  { %4310 = shalt.err (!%p4307_p12)
}
  0x43   :  { %s4311_s5 = scalar_lea.vmem %s118_s17, 16  ;;  %s4315_s18 = scalar_lea.vmem %s118_s17, 32 }
  0x44   :  { %p4312_p13 = scmp.ne.s32.totalorder %s118_s17, %s4311_s5  ;;  %p4316_p0 = scmp.lt.s32.totalorder %s118_s17, %s118_s17 }
  0x45   :  { %p4317_p1 = scmp.lt.s32.totalorder %s4315_s18, %s4311_s5 }
  0x47   :  { %p4318_p2 = por %p4317_p1, %p4316_p0 }
  0x49   :  { %p4319_p3 = pnand %p4318_p2, %p4312_p13 }
  0x4b   :  { %4322 = shalt.err (!%p4319_p3)
}
  0x4c   :  { %120 = dma.hbm_to_vmem [thread:$0]  %s5683_s7, 16, %s118_s17, [#allocation15]  }
  0x4d   :  { %s4323_s30 = scalar_lea.hbm %s5685_s9, 1024 }
  0x4e   :  { %p4324_p4 = scmp.ne.s32.totalorder %s5685_s9, %s4323_s30  ;;  %p4327_p5 = scmp.lt.u32.totalorder %s4323_s30, %s5685_s9 }
  0x50   :  { %p4329_p6 = pnand %p4327_p5, %p4324_p4 }
  0x52   :  { %4332 = shalt.err (!%p4329_p6)
}
  0x53   :  { %s4333_s27 = scalar_lea.vmem %s139_s22, 1024  ;;  %p4338_p8 = scmp.lt.s32.totalorder %s139_s22, %s139_s22 }
  0x54   :  { %p4334_p7 = scmp.ne.s32.totalorder %s139_s22, %s4333_s27  ;;  %p4339_p9 = scmp.lt.s32.totalorder %s4333_s27, %s4333_s27 }
  0x56   :  { %p4340_p10 = por %p4339_p9, %p4338_p8 }
  0x58   :  { %p4341_p11 = pnand %p4340_p10, %p4334_p7 }
  0x5a   :  { %4344 = shalt.err (!%p4341_p11)
}
  0x5b   :  { %144 = dma.hbm_to_vmem [thread:$0]  %s5685_s9, 1024, %s139_s22, [#allocation18], %s4610_s3, %s4610_s3, %s4611_s21  }
  0x5c   :  { %s4614_s28 = smov [#allocation20]   ;;  %s4615_s18 = smov [#allocation23]  }
  0x5d   :  { %s162_s5 = sshll.u32 %s4614_s28, 4  ;;  %s184_s1 = sshll.u32 %s4615_s18, 4  ;;  %s163_s5 = int_to_ptr.vmem [resolvable:$true] %s162_s5  ;;  %s185_s1 = int_to_ptr.vmem [resolvable:$true] %s184_s1 }
  0x5e   :  { %s4345_s20 = scalar_lea.hbm %s5687_s11, 1024 }
  0x5f   :  { %p4346_p12 = scmp.ne.s32.totalorder %s5687_s11, %s4345_s20  ;;  %p4349_p13 = scmp.lt.u32.totalorder %s4345_s20, %s5687_s11 }
  0x61   :  { %p4351_p0 = pnand %p4349_p13, %p4346_p12 }
  0x63   :  { %4354 = shalt.err (!%p4351_p0)
}
  0x64   :  { %s4355_s9 = scalar_lea.vmem %s163_s5, 1024  ;;  %p4360_p2 = scmp.lt.s32.totalorder %s163_s5, %s163_s5 }
  0x65   :  { %p4356_p1 = scmp.ne.s32.totalorder %s163_s5, %s4355_s9  ;;  %p4361_p3 = scmp.lt.s32.totalorder %s4355_s9, %s4355_s9 }
  0x67   :  { %p4362_p4 = por %p4361_p3, %p4360_p2 }
  0x69   :  { %p4363_p5 = pnand %p4362_p4, %p4356_p1 }
  0x6b   :  { %4366 = shalt.err (!%p4363_p5)
}
  0x6c   :  { %168 = dma.hbm_to_vmem [thread:$0]  %s5687_s11, 1024, %s163_s5, [#allocation21], %s4610_s3, %s4610_s3, %s4611_s21  }
  0x6d   :  { %s4367_s17 = scalar_lea.hbm %s5689_s13, 1024 }
  0x6e   :  { %p4368_p6 = scmp.ne.s32.totalorder %s5689_s13, %s4367_s17  ;;  %p4371_p7 = scmp.lt.u32.totalorder %s4367_s17, %s5689_s13 }
  0x70   :  { %p4373_p8 = pnand %p4371_p7, %p4368_p6 }
  0x72   :  { %4376 = shalt.err (!%p4373_p8)
}
  0x73   :  { %s4377_s20 = scalar_lea.vmem %s185_s1, 1024  ;;  %p4382_p10 = scmp.lt.s32.totalorder %s185_s1, %s185_s1 }
  0x74   :  { %p4378_p9 = scmp.ne.s32.totalorder %s185_s1, %s4377_s20  ;;  %p4383_p11 = scmp.lt.s32.totalorder %s4377_s20, %s4377_s20 }
  0x76   :  { %p4384_p12 = por %p4383_p11, %p4382_p10 }
  0x78   :  { %p4385_p13 = pnand %p4384_p12, %p4378_p9 }
  0x7a   :  { %4388 = shalt.err (!%p4385_p13)
}
  0x7b   :  { %190 = dma.hbm_to_vmem [thread:$0]  %s5689_s13, 1024, %s185_s1, [#allocation24], %s4610_s3, %s4610_s3, %s4611_s21  }
  0x7c   :  { %s4616_s30 = smov [#allocation2]   ;;  %s4617_s24 = smov [#allocation7]  }
  0x7d   :  { %s34_s23 = sshll.u32 %s4616_s30, 4  ;;  %s58_s25 = sshll.u32 %s4617_s24, 4  ;;  %s35_s23 = int_to_ptr.vmem [resolvable:$true] %s34_s23  ;;  %s59_s25 = int_to_ptr.vmem [resolvable:$true] %s58_s25 }
  0x7e   :  { %s4389_s26 = scalar_lea.hbm %s5676_s0, 2048 }
  0x7f   :  { %p4390_p0 = scmp.ne.s32.totalorder %s5676_s0, %s4389_s26  ;;  %p4393_p1 = scmp.lt.u32.totalorder %s4389_s26, %s5676_s0 }
  0x81   :  { %p4395_p2 = pnand %p4393_p1, %p4390_p0 }
  0x83   :  { %4398 = shalt.err (!%p4395_p2)
}
  0x84   :  { %s4399_s13 = scalar_lea.vmem %s35_s23, 2048  ;;  %p4404_p4 = scmp.lt.s32.totalorder %s35_s23, %s35_s23 }
  0x85   :  { %p4400_p3 = scmp.ne.s32.totalorder %s35_s23, %s4399_s13  ;;  %p4405_p5 = scmp.lt.s32.totalorder %s4399_s13, %s4399_s13 }
  0x87   :  { %p4406_p6 = por %p4405_p5, %p4404_p4 }
  0x89   :  { %p4407_p7 = pnand %p4406_p6, %p4400_p3 }
  0x8b   :  { %4410 = shalt.err (!%p4407_p7)
}
  0x8c   :  { %s5749_s1 = smov 128   ;;  %s4411_s11 = scalar_lea.hbm %s5678_s2, 2048 }
  0x8d   :  { %40 = dma.hbm_to_vmem [thread:$0]  %s5676_s0, 2048, %s35_s23, [#allocation3], %s5749_s1, %s5749_s1, %s4608_s16  }
  0x8e   :  { %p4412_p8 = scmp.ne.s32.totalorder %s5678_s2, %s4411_s11  ;;  %p4415_p9 = scmp.lt.u32.totalorder %s4411_s11, %s5678_s2 }
  0x90   :  { %p4417_p10 = pnand %p4415_p9, %p4412_p8 }
  0x92   :  { %4420 = shalt.err (!%p4417_p10)
}
  0x93   :  { %s4421_s22 = scalar_lea.vmem %s59_s25, 2048  ;;  %p4426_p12 = scmp.lt.s32.totalorder %s59_s25, %s59_s25 }
  0x94   :  { %p4422_p11 = scmp.ne.s32.totalorder %s59_s25, %s4421_s22  ;;  %p4427_p13 = scmp.lt.s32.totalorder %s4421_s22, %s4421_s22 }
  0x96   :  { %p4428_p0 = por %p4427_p13, %p4426_p12 }
  0x98   :  { %p4429_p1 = pnand %p4428_p0, %p4422_p11 }
  0x9a   :  { %4432 = shalt.err (!%p4429_p1)
}
  0x9b   :  { %64 = dma.hbm_to_vmem [thread:$0]  %s5678_s2, 2048, %s59_s25, [#allocation6], %s5749_s1, %s5749_s1, %s4608_s16  }
  0x9c   :  { %s4618_s26 = smov [#allocation10]   ;;  %s4619_s7 = smov [#allocation13]  }
  0x9d   :  { %s80_s27 = sshll.u32 %s4618_s26, 4  ;;  %s104_s17 = sshll.u32 %s4619_s7, 4  ;;  %s81_s27 = int_to_ptr.vmem [resolvable:$true] %s80_s27  ;;  %s105_s17 = int_to_ptr.vmem [resolvable:$true] %s104_s17 }
  0x9e   :  { %s4433_s18 = scalar_lea.hbm %s5680_s4, 2048 }
  0x9f   :  { %p4434_p2 = scmp.ne.s32.totalorder %s5680_s4, %s4433_s18  ;;  %p4437_p3 = scmp.lt.u32.totalorder %s4433_s18, %s5680_s4 }
  0xa1   :  { %p4439_p4 = pnand %p4437_p3, %p4434_p2 }
  0xa3   :  { %4442 = shalt.err (!%p4439_p4)
}
  0xa4   :  { %s4443_s2 = scalar_lea.vmem %s81_s27, 2048  ;;  %p4448_p6 = scmp.lt.s32.totalorder %s81_s27, %s81_s27 }
  0xa5   :  { %p4444_p5 = scmp.ne.s32.totalorder %s81_s27, %s4443_s2  ;;  %p4449_p7 = scmp.lt.s32.totalorder %s4443_s2, %s4443_s2 }
  0xa7   :  { %p4450_p8 = por %p4449_p7, %p4448_p6 }
  0xa9   :  { %p4451_p9 = pnand %p4450_p8, %p4444_p5 }
  0xab   :  { %4454 = shalt.err (!%p4451_p9)
}
  0xac   :  { %86 = dma.hbm_to_vmem [thread:$0]  %s5680_s4, 2048, %s81_s27, [#allocation9], %s5749_s1, %s5749_s1, %s4608_s16  }
  0xad   :  { %s4455_s9 = scalar_lea.hbm %s5682_s6, 1024 }
  0xae   :  { %p4456_p10 = scmp.ne.s32.totalorder %s5682_s6, %s4455_s9  ;;  %p4459_p11 = scmp.lt.u32.totalorder %s4455_s9, %s5682_s6 }
  0xb0   :  { %p4461_p12 = pnand %p4459_p11, %p4456_p10 }
  0xb2   :  { %4464 = shalt.err (!%p4461_p12)
}
  0xb3   :  { %s4465_s7 = scalar_lea.vmem %s105_s17, 1024  ;;  %p4470_p0 = scmp.lt.s32.totalorder %s105_s17, %s105_s17 }
  0xb4   :  { %p4466_p13 = scmp.ne.s32.totalorder %s105_s17, %s4465_s7  ;;  %p4471_p1 = scmp.lt.s32.totalorder %s4465_s7, %s4465_s7 }
  0xb6   :  { %p4472_p2 = por %p4471_p1, %p4470_p0 }
  0xb8   :  { %p4473_p3 = pnand %p4472_p2, %p4466_p13 }
  0xba   :  { %4476 = shalt.err (!%p4473_p3)
}
  0xbb   :  { %110 = dma.hbm_to_vmem [thread:$0]  %s5682_s6, 1024, %s105_s17, [#allocation12], %s4610_s3, %s4610_s3, %s4611_s21  }
  0xbc   :  { %s4620_s28 = smov [#allocation16]   ;;  %s4621_s18 = smov [#allocation19]  }
  0xbd   :  { %s126_s13 = sshll.u32 %s4620_s28, 4  ;;  %s150_s19 = sshll.u32 %s4621_s18, 4  ;;  %s127_s13 = int_to_ptr.vmem [resolvable:$true] %s126_s13  ;;  %s151_s19 = int_to_ptr.vmem [resolvable:$true] %s150_s19 }
  0xbe   :  { %s4477_s11 = scalar_lea.hbm %s5684_s8, 1024 }
  0xbf   :  { %p4478_p4 = scmp.ne.s32.totalorder %s5684_s8, %s4477_s11  ;;  %p4481_p5 = scmp.lt.u32.totalorder %s4477_s11, %s5684_s8 }
  0xc1   :  { %p4483_p6 = pnand %p4481_p5, %p4478_p4 }
  0xc3   :  { %4486 = shalt.err (!%p4483_p6)
}
  0xc4   :  { %s4487_s6 = scalar_lea.vmem %s127_s13, 1024  ;;  %p4492_p8 = scmp.lt.s32.totalorder %s127_s13, %s127_s13 }
  0xc5   :  { %p4488_p7 = scmp.ne.s32.totalorder %s127_s13, %s4487_s6  ;;  %p4493_p9 = scmp.lt.s32.totalorder %s4487_s6, %s4487_s6 }
  0xc7   :  { %p4494_p10 = por %p4493_p9, %p4492_p8 }
  0xc9   :  { %p4495_p11 = pnand %p4494_p10, %p4488_p7 }
  0xcb   :  { %4498 = shalt.err (!%p4495_p11)
}
  0xcc   :  { %132 = dma.hbm_to_vmem [thread:$0]  %s5684_s8, 1024, %s127_s13, [#allocation15], %s4610_s3, %s4610_s3, %s4611_s21  }
  0xcd   :  { %s4499_s0 = scalar_lea.hbm %s5686_s10, 1024 }
  0xce   :  { %p4500_p12 = scmp.ne.s32.totalorder %s5686_s10, %s4499_s0  ;;  %p4503_p13 = scmp.lt.u32.totalorder %s4499_s0, %s5686_s10 }
  0xd0   :  { %p4505_p0 = pnand %p4503_p13, %p4500_p12 }
  0xd2   :  { %4508 = shalt.err (!%p4505_p0)
}
  0xd3   :  { %s4509_s27 = scalar_lea.vmem %s151_s19, 1024  ;;  %p4514_p2 = scmp.lt.s32.totalorder %s151_s19, %s151_s19 }
  0xd4   :  { %p4510_p1 = scmp.ne.s32.totalorder %s151_s19, %s4509_s27  ;;  %p4515_p3 = scmp.lt.s32.totalorder %s4509_s27, %s4509_s27 }
  0xd6   :  { %p4516_p4 = por %p4515_p3, %p4514_p2 }
  0xd8   :  { %p4517_p5 = pnand %p4516_p4, %p4510_p1 }
  0xda   :  { %4520 = shalt.err (!%p4517_p5)
}
  0xdb   :  { %156 = dma.hbm_to_vmem [thread:$0]  %s5686_s10, 1024, %s151_s19, [#allocation18], %s4610_s3, %s4610_s3, %s4611_s21  }
  0xdc   :  { %s4622_s13 = smov [#allocation22]   ;;  %s4623_s29 = smov [#allocation25]  }
  0xdd   :  { %s175_s18 = sshll.u32 %s4622_s13, 4  ;;  %s196_s20 = sshll.u32 %s4623_s29, 4  ;;  %s176_s18 = int_to_ptr.vmem [resolvable:$true] %s175_s18  ;;  %s197_s20 = int_to_ptr.vmem [resolvable:$true] %s196_s20 }
  0xde   :  { %s4521_s25 = scalar_lea.hbm %s5688_s12, 16 }
  0xdf   :  { %p4522_p6 = scmp.ne.s32.totalorder %s5688_s12, %s4521_s25  ;;  %p4525_p7 = scmp.lt.u32.totalorder %s4521_s25, %s5688_s12 }
  0xe1   :  { %p4527_p8 = pnand %p4525_p7, %p4522_p6 }
  0xe3   :  { %4530 = shalt.err (!%p4527_p8)
}
  0xe4   :  { %s4531_s10 = scalar_lea.vmem %s176_s18, 16  ;;  %s4535_s19 = scalar_lea.vmem %s176_s18, 32 }
  0xe5   :  { %p4532_p9 = scmp.ne.s32.totalorder %s176_s18, %s4531_s10  ;;  %p4536_p10 = scmp.lt.s32.totalorder %s176_s18, %s176_s18 }
  0xe6   :  { %p4537_p11 = scmp.lt.s32.totalorder %s4535_s19, %s4531_s10 }
  0xe8   :  { %p4538_p12 = por %p4537_p11, %p4536_p10 }
  0xea   :  { %p4539_p13 = pnand %p4538_p12, %p4532_p9 }
  0xec   :  { %4542 = shalt.err (!%p4539_p13)
}
  0xed   :  { %178 = dma.hbm_to_vmem [thread:$0]  %s5688_s12, 16, %s176_s18, [#allocation21]  }
  0xee   :  { %s4543_s23 = scalar_lea.hbm %s5690_s14, 1024 }
  0xef   :  { %p4544_p0 = scmp.ne.s32.totalorder %s5690_s14, %s4543_s23  ;;  %p4547_p1 = scmp.lt.u32.totalorder %s4543_s23, %s5690_s14 }
  0xf1   :  { %p4549_p2 = pnand %p4547_p1, %p4544_p0 }
  0xf3   :  { %4552 = shalt.err (!%p4549_p2)
}
  0xf4   :  { %s4553_s8 = scalar_lea.vmem %s197_s20, 1024  ;;  %p4558_p4 = scmp.lt.s32.totalorder %s197_s20, %s197_s20 }
  0xf5   :  { %p4554_p3 = scmp.ne.s32.totalorder %s197_s20, %s4553_s8  ;;  %p4559_p5 = scmp.lt.s32.totalorder %s4553_s8, %s4553_s8 }
  0xf7   :  { %p4560_p6 = por %p4559_p5, %p4558_p4 }
  0xf9   :  { %p4561_p7 = pnand %p4560_p6, %p4554_p3 }
  0xfb   :  { %4564 = shalt.err (!%p4561_p7)
}
  0xfc   :  { %202 = dma.hbm_to_vmem [thread:$0]  %s5690_s14, 1024, %s197_s20, [#allocation24], %s4610_s3, %s4610_s3, %s4611_s21  }
  0xfd   :  { %4587 = dma.done.wait [#allocation3], 2048  }
  0xfe   :  { %4588 = vsyncadd [#allocation3], 4294965248 }
  0xff   :  { %4589 = dma.done.wait [#allocation6], 4096  }
 0x100   :  { %4590 = vsyncadd [#allocation6], 4294963200 }
 0x101   :  { %4591 = dma.done.wait [#allocation9], 2064  }
 0x102   :  { %4592 = vsyncadd [#allocation9], 4294965232 }
 0x103   :  { %4593 = dma.done.wait [#allocation12], 2048  }
 0x104   :  { %4594 = vsyncadd [#allocation12], 4294965248 }
 0x105   :  { %4595 = dma.done.wait [#allocation15], 1040  }
 0x106   :  { %4596 = vsyncadd [#allocation15], 4294966256 }
 0x107   :  { %4597 = dma.done.wait [#allocation18], 2048  }
 0x108   :  { %4598 = vsyncadd [#allocation18], 4294965248 }
 0x109   :  { %4599 = dma.done.wait [#allocation21], 1040  }
 0x10a   :  { %4600 = vsyncadd [#allocation21], 4294966256 }
 0x10b   :  { %4601 = dma.done.wait [#allocation24], 2048  }
 0x10c   :  { %4602 = vsyncadd [#allocation24], 4294965248  ;;  %v4624_v0 = vmov 0   ;;  %v4171_v1 = vld [vmem:[#allocation11] sm:$0xff]   ;;  %v4172_v2 = vld [vmem:[#allocation11 + $0x8] sm:$0xff]   ;;  %s4626_s14 = smov [#allocation26]  }
 0x10d   :  { %4169 = vset.pattern.permute.xlu0 %v4624_v0  ;;  %4170 = vset.pattern.permute.xlu1 %v4624_v0  ;;  %v4173_v3 = vld [vmem:[#allocation11 + $0x10] sm:$0xff]   ;;  %v4174_v4 = vld [vmem:[#allocation11 + $0x18] sm:$0xff]   ;;  %v250_v6 = vld [vmem:[#allocation2 + $0x8] sm:$0xff]  ;;  %s3021_s3 = sshll.u32 %s4626_s14, 4  ;;  %s3022_s3 = int_to_ptr.vmem [resolvable:$true] %s3021_s3 }
 0x10e   :  { %3539 = vmatprep.subr.bf16.mxu1 %v4171_v1  ;;  %v249_v5 = vld [vmem:[#allocation2] sm:$0xff]  ;;  %v291_v10 = vld [vmem:[#allocation7 + $0x10] sm:$0xff]  ;;  %v290_v11 = vld [vmem:[#allocation7 + $0x8] sm:$0xff]  ;;  %s4565_s21 = scalar_lea.vmem %s3022_s3, 2048  ;;  %p4570_p9 = scmp.lt.s32.totalorder %s3022_s3, %s3022_s3 }
 0x10f   :  { %3540 = vmatpush3.bf16.msra.mxu1 %v4171_v1  ;;  %v4931_v7 = vpack.c.bf16 %v250_v6, %v249_v5  ;;  %v4175_v8 = vld [vmem:[#allocation11 + $0x20] sm:$0xff]   ;;  %331 = vperm.xlu1 %4170, %v291_v10   ;;  %v292_v12 = vld [vmem:[#allocation7 + $0x18] sm:$0xff]  ;;  %v4176_v13 = vld [vmem:[#allocation11 + $0x28] sm:$0xff]   ;;  %p4566_p8 = scmp.ne.s32.totalorder %s3022_s3, %s4565_s21  ;;  %p4571_p10 = scmp.lt.s32.totalorder %s4565_s21, %s4565_s21 }
 0x110   :  { %3541 = vmatprep.subr.bf16.mxu1 %v4172_v2  ;;  %v289_v9 = vld [vmem:[#allocation7] sm:$0xff]  ;;  %v294_v15 = vld [vmem:[#allocation7 + $0x28] sm:$0xff]  ;;  %v4177_v16 = vld [vmem:[#allocation11 + $0x30] sm:$0xff]  }
 0x111   :  { %3555 = vmatprep.mubr.bf16.mxu1 %v4931_v7  ;;  %325 = vperm.xlu0 %4169, %v289_v9   ;;  %v293_v14 = vld [vmem:[#allocation7 + $0x20] sm:$0xff]  ;;  %v295_v18 = vld [vmem:[#allocation7 + $0x30] sm:$0xff]  ;;  %v296_v19 = vld [vmem:[#allocation7 + $0x38] sm:$0xff]  ;;  %p4572_p11 = por %p4571_p10, %p4570_p9 }
 0x112   :  { %v4178_v17 = vld [vmem:[#allocation11 + $0x38] sm:$0xff]   ;;  %v4179_v20 = vld [vmem:[#allocation13] sm:$0xff]   ;;  %v251_v21 = vld [vmem:[#allocation2 + $0x10] sm:$0xff] }
 0x113   :  { %3542 = vmatpush3.bf16.msra.mxu1 %v4172_v2  ;;  %334 = vperm.xlu1 %4170, %v292_v12   ;;  %v252_v22 = vld [vmem:[#allocation2 + $0x18] sm:$0xff]  ;;  %v297_v23 = vld [vmem:[#allocation7 + $0x40] sm:$0xff]  ;;  %v4180_v24 = vld [vmem:[#allocation13 + $0x8] sm:$0xff]   ;;  %p4573_p12 = pnand %p4572_p11, %p4566_p8 }
 0x114   :  { %3543 = vmatprep.subr.bf16.mxu1 %v4173_v3  ;;  %v253_v25 = vld [vmem:[#allocation2 + $0x20] sm:$0xff]  ;;  %v254_v26 = vld [vmem:[#allocation2 + $0x28] sm:$0xff]  ;;  %3507 = vmatprep.subr.bf16.mxu0 %v4179_v20  ;;  %v4181_v28 = vld [vmem:[#allocation13 + $0x10] sm:$0xff]   ;;  %v4934_v30 = vpack.c.bf16 %v252_v22, %v251_v21 }
 0x115   :  { %328 = vperm.xlu0 %4169, %v290_v11   ;;  %v298_v27 = vld [vmem:[#allocation7 + $0x48] sm:$0xff]  ;;  %3508 = vmatpush3.bf16.msra.mxu0 %v4179_v20  ;;  %v299_v29 = vld [vmem:[#allocation7 + $0x50] sm:$0xff]  ;;  %v300_v31 = vld [vmem:[#allocation7 + $0x58] sm:$0xff]  ;;  %v4936_v32 = vpack.c.bf16 %v254_v26, %v253_v25 }
 0x116   :  { %3509 = vmatprep.subr.bf16.mxu0 %v4180_v24  ;;  %v4182_v33 = vld [vmem:[#allocation13 + $0x18] sm:$0xff]   ;;  %v255_v34 = vld [vmem:[#allocation2 + $0x30] sm:$0xff]  ;;  %v258_v38 = vld [vmem:[#allocation2 + $0x48] sm:$0xff] }
 0x117   :  { %3544 = vmatpush3.bf16.msra.mxu1 %v4173_v3  ;;  %340 = vperm.xlu1 %4170, %v294_v15   ;;  %v256_v35 = vld [vmem:[#allocation2 + $0x38] sm:$0xff]  ;;  %v301_v36 = vld [vmem:[#allocation7 + $0x60] sm:$0xff]  ;;  %v302_v39 = vld [vmem:[#allocation7 + $0x68] sm:$0xff] }
 0x118   :  { %3545 = vmatprep.subr.bf16.mxu1 %v4174_v4  ;;  %v257_v37 = vld [vmem:[#allocation2 + $0x40] sm:$0xff]  ;;  %v303_v41 = vld [vmem:[#allocation7 + $0x70] sm:$0xff]  ;;  %v4940_v42 = vpack.c.bf16 %v256_v35, %v255_v34  ;;  %v304_v43 = vld [vmem:[#allocation7 + $0x78] sm:$0xff] }
 0x119   :  { %337 = vperm.xlu0 %4169, %v293_v14   ;;  %3510 = vmatpush3.bf16.msra.mxu0 %v4180_v24  ;;  %v4183_v40 = vld [vmem:[#allocation13 + $0x20] sm:$0xff]   ;;  %v4942_v44 = vpack.c.bf16 %v258_v38, %v257_v37  ;;  %v4184_v45 = vld [vmem:[#allocation13 + $0x28] sm:$0xff]   ;;  %v260_v47 = vld [vmem:[#allocation2 + $0x58] sm:$0xff]  ;;  %v322_v24 = vlaneseq }
 0x11a   :  { %3511 = vmatprep.subr.bf16.mxu0 %v4181_v28  ;;  %v259_v46 = vld [vmem:[#allocation2 + $0x50] sm:$0xff]  ;;  %v306_v48 = vld [vmem:[#allocation10] sm:$0xff]  ;;  %v309_v55 = vld [vmem:[#allocation10 + $0x18] sm:$0xff] }
 0x11b   :  { %3546 = vmatpush3.bf16.msra.mxu1 %v4174_v4  ;;  %346 = vperm.xlu1 %4170, %v296_v19   ;;  %v261_v49 = vld [vmem:[#allocation2 + $0x60] sm:$0xff]  ;;  %v262_v50 = vld [vmem:[#allocation2 + $0x68] sm:$0xff]  ;;  %v4185_v52 = vld [vmem:[#allocation13 + $0x30] sm:$0xff]   ;;  %v4946_v54 = vpack.c.bf16 %v260_v47, %v259_v46 }
 0x11c   :  { %3547 = vmatprep.subr.bf16.mxu1 %v4175_v8  ;;  %v307_v51 = vld [vmem:[#allocation10 + $0x8] sm:$0xff]  ;;  %v308_v53 = vld [vmem:[#allocation10 + $0x10] sm:$0xff]  ;;  %v4948_v56 = vpack.c.bf16 %v262_v50, %v261_v49  ;;  %v310_v59 = vld [vmem:[#allocation10 + $0x20] sm:$0xff] }
 0x11d   :  { %343 = vperm.xlu0 %4169, %v295_v18   ;;  %3512 = vmatpush3.bf16.msra.mxu0 %v4181_v28  ;;  %v263_v57 = vld [vmem:[#allocation2 + $0x70] sm:$0xff]  ;;  %v264_v58 = vld [vmem:[#allocation2 + $0x78] sm:$0xff]  ;;  %v314_v0 = vld [vmem:[#allocation10 + $0x40] sm:$0xff] }
 0x11e   :  { %3513 = vmatprep.subr.bf16.mxu0 %v4182_v33  ;;  %v311_v60 = vld [vmem:[#allocation10 + $0x28] sm:$0xff]  ;;  %v312_v61 = vld [vmem:[#allocation10 + $0x30] sm:$0xff]  ;;  %v4952_v62 = vpack.c.bf16 %v264_v58, %v263_v57  ;;  %v313_v63 = vld [vmem:[#allocation10 + $0x38] sm:$0xff] }
 0x11f   :  { %3548 = vmatpush3.bf16.msra.mxu1 %v4175_v8  ;;  %352 = vperm.xlu1 %4170, %v298_v27   ;;  %v315_v1 = vld [vmem:[#allocation10 + $0x48] sm:$0xff]  ;;  %v316_v2 = vld [vmem:[#allocation10 + $0x50] sm:$0xff]  ;;  %v317_v3 = vld [vmem:[#allocation10 + $0x58] sm:$0xff] }
 0x120   :  { %3549 = vmatprep.subr.bf16.mxu1 %v4176_v13  ;;  %v318_v4 = vld [vmem:[#allocation10 + $0x60] sm:$0xff]  ;;  %v319_v5 = vld [vmem:[#allocation10 + $0x68] sm:$0xff]  ;;  %v320_v6 = vld [vmem:[#allocation10 + $0x70] sm:$0xff] }
 0x121   :  { %349 = vperm.xlu0 %4169, %v297_v23   ;;  %3514 = vmatpush3.bf16.msra.mxu0 %v4182_v33  ;;  %v321_v8 = vld [vmem:[#allocation10 + $0x78] sm:$0xff]  ;;  %v266_v11 = vld [vmem:[#allocation5 + $0x8] sm:$0xff]  ;;  %v271_v19 = vld [vmem:[#allocation5 + $0x30] sm:$0xff] }
 0x122   :  { %3515 = vmatprep.subr.bf16.mxu0 %v4183_v40  ;;  %v4186_v9 = vld [vmem:[#allocation13 + $0x38] sm:$0xff]   ;;  %v274_v23 = vld [vmem:[#allocation5 + $0x48] sm:$0xff]  ;;  %v275_v26 = vld [vmem:[#allocation5 + $0x50] sm:$0xff] }
 0x123   :  { %3550 = vmatpush3.bf16.msra.mxu1 %v4176_v13  ;;  %358 = vperm.xlu1 %4170, %v300_v31   ;;  %v265_v10 = vld [vmem:[#allocation5] sm:$0xff]  ;;  %v267_v13 = vld [vmem:[#allocation5 + $0x10] sm:$0xff]  ;;  %v268_v14 = vld [vmem:[#allocation5 + $0x18] sm:$0xff] }
 0x124   :  { %3551 = vmatprep.subr.bf16.mxu1 %v4177_v16  ;;  %v4955_v12 = vpack.c.bf16 %v266_v11, %v265_v10  ;;  %v4957_v15 = vpack.c.bf16 %v268_v14, %v267_v13  ;;  %v272_v20 = vld [vmem:[#allocation5 + $0x38] sm:$0xff]  ;;  %v273_v22 = vld [vmem:[#allocation5 + $0x40] sm:$0xff]  ;;  %v278_v34 = vld [vmem:[#allocation5 + $0x68] sm:$0xff] }
 0x125   :  { %355 = vperm.xlu0 %4169, %v299_v29   ;;  %3516 = vmatpush3.bf16.msra.mxu0 %v4183_v40  ;;  %v4963_v21 = vpack.c.bf16 %v272_v20, %v271_v19  ;;  %v4967_v25 = vpack.c.bf16 %v274_v23, %v273_v22  ;;  %v276_v27 = vld [vmem:[#allocation5 + $0x58] sm:$0xff]  ;;  %v4974_v29 = vand.u32 127, %v322_v24  ;;  %v277_v33 = vld [vmem:[#allocation5 + $0x60] sm:$0xff]  ;;  %v5750_v40 = vmov 0 }
 0x126   :  { %3517 = vmatprep.subr.bf16.mxu0 %v4184_v45  ;;  %3523 = vmatprep.mubr.bf16.mxu0 %v4955_v12  ;;  %v4969_v28 = vpack.c.bf16 %v276_v27, %v275_v26  ;;  %v4977_v35 = vpack.c.bf16 %v278_v34, %v277_v33  ;;  %v280_v37 = vld [vmem:[#allocation5 + $0x78] sm:$0xff]  ;;  %v5757_v26 = vmov 0  ;;  %v5759_v27 = vmov 0 }
 0x127   :  { %3552 = vmatpush3.bf16.msra.mxu1 %v4177_v16  ;;  %364 = vperm.xlu1 %4170, %v302_v39   ;;  %v269_v16 = vld [vmem:[#allocation5 + $0x20] sm:$0xff]  ;;  %v5761_v34 = vmov 0 }
 0x128   :  { %3553 = vmatprep.subr.bf16.mxu1 %v4178_v17 }
 0x129   :  { %361 = vperm.xlu0 %4169, %v301_v36   ;;  %3518 = vmatpush3.bf16.msra.mxu0 %v4184_v45  ;;  %v279_v36 = vld [vmem:[#allocation5 + $0x70] sm:$0xff] }
 0x12a   :  { %3519 = vmatprep.subr.bf16.mxu0 %v4185_v52  ;;  %v4979_v39 = vpack.c.bf16 %v280_v37, %v279_v36  ;;  %v5764_v36 = vmov 0 }
 0x12b   :  { %3554 = vmatpush3.bf16.msra.mxu1 %v4178_v17  ;;  %370 = vperm.xlu1 %4170, %v304_v43   ;;  %v270_v17 = vld [vmem:[#allocation5 + $0x28] sm:$0xff] }
 0x12c   :  { %v4961_v18 = vpack.c.bf16 %v270_v17, %v269_v16  ;;  %v5755_v17 = vmov 0 }
 0x12d   :  { %367 = vperm.xlu0 %4169, %v303_v41   ;;  %3520 = vmatpush3.bf16.msra.mxu0 %v4185_v52  ;;  %v5706_v41 = vmov 1.0|1.0  }
 0x12e   :  { %3556 = vmatmul.mubr.bf16.vlgmr.msra.gmra.mrb[0].mxu1 %v4934_v30  ;;  %3521 = vmatprep.subr.bf16.mxu0 %v4186_v9 }
 0x12f   :  { %3559 = vmatprep.mubr.bf16.mxu1 %v4936_v32  ;;  %1107 = vperm.xlu1 %4170, %v307_v51  }
 0x131   :  { %1102 = vperm.xlu0 %4169, %v306_v48   ;;  %3522 = vmatpush3.bf16.msra.mxu0 %v4186_v9 }
 0x133   :  { %1117 = vperm.xlu1 %4170, %v309_v55  }
 0x134   :  { %3524 = vmatmul.mubr.bf16.vlgmr.msra.gmra.mrb[0].mxu0 %v4957_v15 }
 0x135   :  { %1112 = vperm.xlu0 %4169, %v308_v53   ;;  %3527 = vmatprep.mubr.bf16.mxu0 %v4961_v18 }
 0x136   :  { %3560 = vmatmul.mubr.bf16.gmra.mrb[4].mxu1 %v4940_v42 }
 0x137   :  { %3563 = vmatprep.mubr.bf16.mxu1 %v4942_v44  ;;  %1127 = vperm.xlu1 %4170, %v311_v60  }
 0x139   :  { %1122 = vperm.xlu0 %4169, %v310_v59  }
 0x13b   :  { %1137 = vperm.xlu1 %4170, %v313_v63  }
 0x13c   :  { %3528 = vmatmul.mubr.bf16.gmra.mrb[4].mxu0 %v4963_v21 }
 0x13d   :  { %1132 = vperm.xlu0 %4169, %v312_v61   ;;  %3531 = vmatprep.mubr.bf16.mxu0 %v4967_v25 }
 0x13e   :  { %3564 = vmatmul.mubr.bf16.gmra.mrb[8].mxu1 %v4946_v54 }
 0x13f   :  { %3567 = vmatprep.mubr.bf16.mxu1 %v4948_v56  ;;  %1147 = vperm.xlu1 %4170, %v315_v1  }
 0x141   :  { %1142 = vperm.xlu0 %4169, %v314_v0  }
 0x143   :  { %1157 = vperm.xlu1 %4170, %v317_v3  }
 0x144   :  { %3532 = vmatmul.mubr.bf16.gmra.mrb[8].mxu0 %v4969_v28 }
 0x145   :  { %1152 = vperm.xlu0 %4169, %v316_v2   ;;  %3535 = vmatprep.mubr.bf16.mxu0 %v4977_v35 }
 0x146   :  { %3568 = vmatmul.mubr.bf16.gmra.mrb[12].mxu1 %v4952_v62 }
 0x147   :  { %1167 = vperm.xlu1 %4170, %v319_v5  }
 0x149   :  { %1162 = vperm.xlu0 %4169, %v318_v4  }
 0x14b   :  { %1177 = vperm.xlu1 %4170, %v321_v8  }
 0x14c   :  { %3536 = vmatmul.mubr.bf16.gmra.mrb[12].mxu0 %v4979_v39 }
 0x14d   :  { %1172 = vperm.xlu0 %4169, %v320_v6  }
 0x18e   :  { %v332_v58 = vpop.permute.xlu1 %331 }
 0x18f   :  { %vm374_vm3 = vcmp.eq.s32.totalorder %v4974_v29, %v332_v58 }
 0x190   :  { %v326_v31 = vpop.permute.xlu0 %325 }
 0x191   :  { %vm372_vm0 = vcmp.eq.s32.totalorder %v4974_v29, %v326_v31 }
 0x192   :  { %v335_v1 = vpop.permute.xlu1 %334 }
 0x193   :  { %vm375_vm4 = vcmp.eq.s32.totalorder %v4974_v29, %v335_v1 }
 0x194   :  { %v329_v38 = vpop.permute.xlu0 %328  ;;  %vm4995_vm7 = vmpackc.low %vm375_vm4, %vm374_vm3 }
 0x195   :  { %vm373_vm1 = vcmp.eq.s32.totalorder %v4974_v29, %v329_v38 }
 0x196   :  { %vm4983_vm2 = vmpackc.low %vm373_vm1, %vm372_vm0  ;;  %v341_v6 = vpop.permute.xlu1 %340 }
 0x197   :  { %v5751_v40 = vsel %vm4983_vm2, 4294967295, %v5750_v40  ;;  %3587 = vmatprep.mubr.msk.bf16.mxu0 %vm4983_vm2, %v5706_v41  ;;  %vm377_vm6 = vcmp.eq.s32.totalorder %v4974_v29, %v341_v6 }
 0x198   :  { %5752 = vst [vmem:[#allocation36_spill] sm:$0xff] %v5751_v40  ;;  %v338_v4 = vpop.permute.xlu0 %337 }
 0x199   :  { %vm376_vm5 = vcmp.eq.s32.totalorder %v4974_v29, %v338_v4 }
 0x19a   :  { %v347_v14 = vpop.permute.xlu1 %346  ;;  %vm4999_vm8 = vmpackc.low %vm377_vm6, %vm376_vm5 }
 0x19b   :  { %v5756_v17 = vsel %vm4999_vm8, 4294967295, %v5755_v17  ;;  %vm379_vm10 = vcmp.eq.s32.totalorder %v4974_v29, %v347_v14  ;;  %v4192_v14 = vld [vmem:[#allocation17 + $0x28] sm:$0xff]  }
 0x19c   :  { %v344_v13 = vpop.permute.xlu0 %343 }
 0x19d   :  { %vm378_vm9 = vcmp.eq.s32.totalorder %v4974_v29, %v344_v13  ;;  %v4191_v13 = vld [vmem:[#allocation17 + $0x20] sm:$0xff]  }
 0x19e   :  { %v353_v20 = vpop.permute.xlu1 %352  ;;  %vm5013_vm13 = vmpackc.low %vm379_vm10, %vm378_vm9 }
 0x19f   :  { %vm381_vm12 = vcmp.eq.s32.totalorder %v4974_v29, %v353_v20  ;;  %v5758_v26 = vsel %vm5013_vm13, 4294967295, %v5757_v26 }
 0x1a0   :  { %v350_v19 = vpop.permute.xlu0 %349 }
 0x1a1   :  { %vm380_vm11 = vcmp.eq.s32.totalorder %v4974_v29, %v350_v19  ;;  %v3073_v19 = vld [vmem:[#allocation14] ss:$0 sm:$0xff] }
 0x1a2   :  { %v359_v23 = vpop.permute.xlu1 %358  ;;  %vm5017_vm14 = vmpackc.low %vm381_vm12, %vm380_vm11 }
 0x1a3   :  { %v5760_v27 = vsel %vm5017_vm14, 4294967295, %v5759_v27  ;;  %vm383_vm0 = vcmp.eq.s32.totalorder %v4974_v29, %v359_v23 }
 0x1a4   :  { %v356_v22 = vpop.permute.xlu0 %355 }
 0x1a5   :  { %vm382_vm15 = vcmp.eq.s32.totalorder %v4974_v29, %v356_v22 }
 0x1a6   :  { %v365_v33 = vpop.permute.xlu1 %364  ;;  %vm5031_vm4 = vmpackc.low %vm383_vm0, %vm382_vm15 }
 0x1a7   :  { %vm385_vm3 = vcmp.eq.s32.totalorder %v4974_v29, %v365_v33  ;;  %v5762_v34 = vsel %vm5031_vm4, 4294967295, %v5761_v34 }
 0x1a8   :  { %v362_v31 = vpop.permute.xlu0 %361  ;;  %5763 = vst [vmem:[#allocation37_spill] sm:$0xff] %v5762_v34 }
 0x1a9   :  { %vm384_vm1 = vcmp.eq.s32.totalorder %v4974_v29, %v362_v31 }
 0x1aa   :  { %vm5035_vm5 = vmpackc.low %vm385_vm3, %vm384_vm1  ;;  %v371_v38 = vpop.permute.xlu1 %370 }
 0x1ab   :  { %v5765_v36 = vsel %vm5035_vm5, 4294967295, %v5764_v36  ;;  %vm387_vm9 = vcmp.eq.s32.totalorder %v4974_v29, %v371_v38 }
 0x1ac   :  { %5766 = vst [vmem:[#allocation38_spill] sm:$0xff] %v5765_v36  ;;  %v368_v37 = vpop.permute.xlu0 %367 }
 0x1ad   :  { %vm386_vm6 = vcmp.eq.s32.totalorder %v4974_v29, %v368_v37 }
 0x1ae   :  { %vm5047_vm10 = vmpackc.low %vm387_vm9, %vm386_vm6 }
 0x201   :  { %v3557_v43 = vpop.f32.mrb[0].mxu1 }
 0x202   :  { %v811_v45 = vpop.f32.mrb[1].mxu1 }
 0x203   :  { %v3558_v46 = vpop.f32.mrb[2].mxu1 }
 0x204   :  { %v875_v47 = vpack.c.bf16 %v3558_v46, %v3557_v43  ;;  %v814_v48 = vpop.f32.mrb[3].mxu1  ;;  %v5767_v43 = vmov 0 }
 0x205   :  { %v874_v49 = vpack.c.bf16 %v814_v48, %v811_v45  ;;  %v5768_v43 = vsel %vm5047_vm10, 4294967295, %v5767_v43  ;;  %v429_v45 = vshrl.u32 %v322_v24, 7 }
 0x206   :  { %5769 = vst [vmem:[#allocation39_spill] sm:$0xff] %v5768_v43 }
 0x207   :  { %3571 = vmatprep.subr.bf16.mxu0 %v874_v49  ;;  %v430_v46 = vadd.s32 8, %v429_v45  ;;  %v431_v48 = vadd.s32 16, %v429_v45  ;;  %v433_v24 = vadd.s32 32, %v429_v45  ;;  %v437_v58 = vadd.s32 64, %v429_v45 }
 0x208   :  { %3572 = vmatpush3.bf16.msra.mxu0 %v874_v49  ;;  %v432_v49 = vadd.s32 24, %v429_v45  ;;  %v441_v1 = vadd.s32 96, %v429_v45  ;;  %v444_v4 = vadd.s32 120, %v429_v45 }
 0x209   :  { %v3561_v50 = vpop.f32.mrb[4].mxu1  ;;  %3573 = vmatprep.subr.bf16.mxu0 %v875_v47 }
 0x20a   :  { %v827_v51 = vpop.f32.mrb[5].mxu1 }
 0x20b   :  { %v3562_v52 = vpop.f32.mrb[6].mxu1 }
 0x20c   :  { %v877_v53 = vpack.c.bf16 %v3562_v52, %v3561_v50  ;;  %v830_v55 = vpop.f32.mrb[7].mxu1  ;;  %3574 = vmatpush3.bf16.msra.mxu0 %v875_v47  ;;  %v3056_v47 = vld [vmem:[#allocation8] ss:$0 sm:$0xff]  ;;  %v5770_v50 = vmov 0  ;;  %v435_v52 = vadd.s32 48, %v429_v45 }
 0x20d   :  { %v876_v57 = vpack.c.bf16 %v830_v55, %v827_v51  ;;  %vm449_vm11 = vcmp.eq.s32.totalorder %v429_v45, %v3056_v47  ;;  %vm450_vm12 = vcmp.eq.s32.totalorder %v430_v46, %v3056_v47  ;;  %vm451_vm0 = vcmp.eq.s32.totalorder %v431_v48, %v3056_v47 }
 0x20e   :  { %vm5055_vm15 = vmpackc.low %vm450_vm12, %vm449_vm11  ;;  %vm452_vm1 = vcmp.eq.s32.totalorder %v432_v49, %v3056_v47  ;;  %v434_v51 = vadd.s32 40, %v429_v45  ;;  %vm453_vm6 = vcmp.eq.s32.totalorder %v433_v24, %v3056_v47  ;;  %vm455_vm12 = vcmp.eq.s32.totalorder %v435_v52, %v3056_v47 }
 0x20f   :  { %3575 = vmatprep.subr.bf16.mxu0 %v876_v57  ;;  %v5771_v50 = vsel %vm5055_vm15, 4294967295, %v5770_v50  ;;  %3619 = vmatprep.mubr.msk.bf16.mxu1 %vm5055_vm15, %v5706_v41  ;;  %vm5062_vm3 = vmpackc.low %vm452_vm1, %vm451_vm0  ;;  %vm457_vm0 = vcmp.eq.s32.totalorder %v437_v58, %v3056_v47 }
 0x210   :  { %3576 = vmatpush3.bf16.msra.mxu0 %v876_v57  ;;  %5772 = vst [vmem:[#allocation40_spill] sm:$0xff] %v5771_v50  ;;  %vm454_vm9 = vcmp.eq.s32.totalorder %v434_v51, %v3056_v47 }
 0x211   :  { %v3565_v59 = vpop.f32.mrb[8].mxu1  ;;  %3577 = vmatprep.subr.bf16.mxu0 %v877_v53  ;;  %vm5066_vm11 = vmpackc.low %vm454_vm9, %vm453_vm6 }
 0x212   :  { %v843_v60 = vpop.f32.mrb[9].mxu1 }
 0x213   :  { %v3566_v61 = vpop.f32.mrb[10].mxu1 }
 0x214   :  { %v879_v63 = vpack.c.bf16 %v3566_v61, %v3565_v59  ;;  %v846_v0 = vpop.f32.mrb[11].mxu1  ;;  %3578 = vmatpush3.bf16.msra.mxu0 %v877_v53  ;;  %v436_v53 = vadd.s32 56, %v429_v45  ;;  %v438_v59 = vadd.s32 72, %v429_v45  ;;  %v440_v61 = vadd.s32 88, %v429_v45 }
 0x215   :  { %v878_v2 = vpack.c.bf16 %v846_v0, %v843_v60  ;;  %v439_v60 = vadd.s32 80, %v429_v45 }
 0x216   :  { %vm458_vm1 = vcmp.eq.s32.totalorder %v438_v59, %v3056_v47  ;;  %vm460_vm9 = vcmp.eq.s32.totalorder %v440_v61, %v3056_v47 }
 0x217   :  { %3579 = vmatprep.subr.bf16.mxu0 %v878_v2  ;;  %vm459_vm6 = vcmp.eq.s32.totalorder %v439_v60, %v3056_v47 }
 0x218   :  { %3580 = vmatpush3.bf16.msra.mxu0 %v878_v2  ;;  %v442_v2 = vadd.s32 104, %v429_v45 }
 0x219   :  { %v3569_v3 = vpop.f32.mrb[12].mxu1  ;;  %3581 = vmatprep.subr.bf16.mxu0 %v879_v63 }
 0x21a   :  { %v859_v5 = vpop.f32.mrb[13].mxu1 }
 0x21b   :  { %v3570_v8 = vpop.f32.mrb[14].mxu1 }
 0x21c   :  { %v881_v9 = vpack.c.bf16 %v3570_v8, %v3569_v3  ;;  %v862_v10 = vpop.f32.mrb[15].mxu1  ;;  %3582 = vmatpush3.bf16.msra.mxu0 %v879_v63  ;;  %v443_v3 = vadd.s32 112, %v429_v45  ;;  %v4187_v8 = vld [vmem:[#allocation17] sm:$0xff]  }
 0x21d   :  { %v880_v11 = vpack.c.bf16 %v862_v10, %v859_v5  ;;  %v4189_v10 = vld [vmem:[#allocation17 + $0x10] sm:$0xff]  }
 0x21f   :  { %3583 = vmatprep.subr.bf16.mxu0 %v880_v11 }
 0x220   :  { %3584 = vmatpush3.bf16.msra.mxu0 %v880_v11  ;;  %v4190_v11 = vld [vmem:[#allocation17 + $0x18] sm:$0xff]  }
 0x221   :  { %3585 = vmatprep.subr.bf16.mxu0 %v881_v9 }
 0x224   :  { %3586 = vmatpush3.bf16.msra.mxu0 %v881_v9  ;;  %v4188_v9 = vld [vmem:[#allocation17 + $0x8] sm:$0xff]  }
 0x225   :  { %3635 = vmatprep.subr.bf16.mxu0 %v4187_v8 }
 0x227   :  { %3588 = vmatmul.mubr.msk.bf16.vlgmr.msra.gmra.mrb[0].mxu0 %vm4995_vm7, %v5706_v41 }
 0x228   :  { %3591 = vmatprep.mubr.msk.bf16.mxu0 %vm4999_vm8, %v5706_v41  ;;  %3636 = vmatpush3.bf16.msra.mxu0 %v4187_v8 }
 0x229   :  { %3637 = vmatprep.subr.bf16.mxu0 %v4188_v9 }
 0x22c   :  { %3638 = vmatpush3.bf16.msra.mxu0 %v4188_v9 }
 0x22d   :  { %3639 = vmatprep.subr.bf16.mxu0 %v4189_v10 }
 0x22f   :  { %3592 = vmatmul.mubr.msk.bf16.gmra.mrb[4].mxu0 %vm5013_vm13, %v5706_v41 }
 0x230   :  { %3595 = vmatprep.mubr.msk.bf16.mxu0 %vm5017_vm14, %v5706_v41  ;;  %vm5078_vm14 = vmpackc.low %vm460_vm9, %vm459_vm6  ;;  %3640 = vmatpush3.bf16.msra.mxu0 %v4189_v10  ;;  %vm5808_vm6 = vnez %v5756_v17  ;;  %vm5809_vm9 = vnez %v5758_v26 }
 0x231   :  { %3641 = vmatprep.subr.bf16.mxu0 %v4190_v11 }
 0x234   :  { %3642 = vmatpush3.bf16.msra.mxu0 %v4190_v11 }
 0x235   :  { %3643 = vmatprep.subr.bf16.mxu0 %v4191_v13 }
 0x237   :  { %3596 = vmatmul.mubr.msk.bf16.gmra.mrb[8].mxu0 %vm5031_vm4, %v5706_v41  ;;  %vm5074_vm4 = vmpackc.low %vm458_vm1, %vm457_vm0  ;;  %vm463_vm0 = vcmp.eq.s32.totalorder %v443_v3, %v3056_v47  ;;  %vm464_vm1 = vcmp.eq.s32.totalorder %v444_v4, %v3056_v47 }
 0x238   :  { %3599 = vmatprep.mubr.msk.bf16.mxu0 %vm5035_vm5, %v5706_v41  ;;  %vm5086_vm8 = vmpackc.low %vm464_vm1, %vm463_vm0  ;;  %3644 = vmatpush3.bf16.msra.mxu0 %v4191_v13  ;;  %vm5812_vm0 = vnez %v5765_v36  ;;  %vm5813_vm1 = vnez %v5768_v43 }
 0x239   :  { %3645 = vmatprep.subr.bf16.mxu0 %v4192_v14 }
 0x23c   :  { %3646 = vmatpush3.bf16.msra.mxu0 %v4192_v14 }
 0x23f   :  { %3600 = vmatmul.mubr.msk.bf16.gmra.mrb[12].mxu0 %vm5047_vm10, %v5706_v41  ;;  %vm456_vm10 = vcmp.eq.s32.totalorder %v436_v53, %v3056_v47 }
 0x240   :  { %vm5070_vm5 = vmpackc.low %vm456_vm10, %vm455_vm12  ;;  %vm461_vm10 = vcmp.eq.s32.totalorder %v441_v1, %v3056_v47  ;;  %vm462_vm12 = vcmp.eq.s32.totalorder %v442_v2, %v3056_v47 }
 0x241   :  { %vm5082_vm13 = vmpackc.low %vm462_vm12, %vm461_vm10  ;;  %vm5810_vm10 = vnez %v5760_v27  ;;  %vm5811_vm12 = vnez %v5762_v34 }
 0x2fa   :  { %v3589_v20 = vpop.f32.mrb[0].mxu0 }
 0x2fb   :  { %v4067_v22 = vadd.f32 %v3589_v20, %v3073_v19  ;;  %v916_v23 = vpop.f32.mrb[1].mxu0 }
 0x2fc   :  { %v4068_v31 = vadd.f32 %v3073_v19, %v916_v23  ;;  %v3590_v33 = vpop.f32.mrb[2].mxu0 }
 0x2fd   :  { %v4069_v37 = vadd.f32 %v3590_v33, %v3073_v19  ;;  %v919_v38 = vpop.f32.mrb[3].mxu0  ;;  %v981_v46 = vmax.f32 %v4067_v22, 0.0 }
 0x2fe   :  { %v4070_v45 = vadd.f32 %v3073_v19, %v919_v38  ;;  %v979_v48 = vmax.f32 %v4068_v31, 0.0 }
 0x2ff   :  { %v982_v47 = vmax.f32 %v4069_v37, 0.0 }
 0x300   :  { %v980_v49 = vmax.f32 %v4070_v45, 0.0 }
 0x301   :  { %v996_v24 = vpack.c.bf16 %v982_v47, %v981_v46 }
 0x302   :  { %v995_v51 = vpack.c.bf16 %v980_v49, %v979_v48  ;;  %v3593_v52 = vpop.f32.mrb[4].mxu0 }
 0x303   :  { %v4071_v53 = vadd.f32 %v3593_v52, %v3073_v19  ;;  %v932_v58 = vpop.f32.mrb[5].mxu0 }
 0x304   :  { %v4072_v59 = vadd.f32 %v3073_v19, %v932_v58  ;;  %v3594_v60 = vpop.f32.mrb[6].mxu0  ;;  %3603 = vmatprep.subr.bf16.mxu1 %v995_v51 }
 0x305   :  { %v4073_v61 = vadd.f32 %v3594_v60, %v3073_v19  ;;  %v935_v1 = vpop.f32.mrb[7].mxu0  ;;  %3604 = vmatpush3.bf16.msra.mxu1 %v995_v51  ;;  %v985_v3 = vmax.f32 %v4071_v53, 0.0 }
 0x306   :  { %v4074_v2 = vadd.f32 %v3073_v19, %v935_v1  ;;  %3605 = vmatprep.subr.bf16.mxu1 %v996_v24  ;;  %v983_v8 = vmax.f32 %v4072_v59, 0.0 }
 0x307   :  { %v986_v4 = vmax.f32 %v4073_v61, 0.0 }
 0x308   :  { %v984_v9 = vmax.f32 %v4074_v2, 0.0 }
 0x309   :  { %v998_v10 = vpack.c.bf16 %v986_v4, %v985_v3  ;;  %3606 = vmatpush3.bf16.msra.mxu1 %v996_v24 }
 0x30a   :  { %v997_v11 = vpack.c.bf16 %v984_v9, %v983_v8  ;;  %v3597_v13 = vpop.f32.mrb[8].mxu0 }
 0x30b   :  { %v4075_v14 = vadd.f32 %v3597_v13, %v3073_v19  ;;  %v948_v20 = vpop.f32.mrb[9].mxu0  ;;  %v4203_v13 = vld [vmem:[#allocation20] sm:$0xff]  }
 0x30c   :  { %v4076_v22 = vadd.f32 %v3073_v19, %v948_v20  ;;  %v3598_v23 = vpop.f32.mrb[10].mxu0  ;;  %3607 = vmatprep.subr.bf16.mxu1 %v997_v11  ;;  %v4205_v20 = vld [vmem:[#allocation20 + $0x10] sm:$0xff]  }
 0x30d   :  { %v4077_v31 = vadd.f32 %v3598_v23, %v3073_v19  ;;  %v951_v33 = vpop.f32.mrb[11].mxu0  ;;  %3608 = vmatpush3.bf16.msra.mxu1 %v997_v11  ;;  %v989_v38 = vmax.f32 %v4075_v14, 0.0  ;;  %v5112_v11 = vld [vmem:[#allocation16] sm:$0xff]   ;;  %v4204_v14 = vld [vmem:[#allocation20 + $0x8] sm:$0xff]  }
 0x30e   :  { %v4078_v37 = vadd.f32 %v3073_v19, %v951_v33  ;;  %3609 = vmatprep.subr.bf16.mxu1 %v998_v10  ;;  %v987_v46 = vmax.f32 %v4076_v22, 0.0  ;;  %v4206_v22 = vld [vmem:[#allocation20 + $0x18] sm:$0xff]   ;;  %v4208_v23 = vld [vmem:[#allocation20 + $0x28] sm:$0xff]  }
 0x30f   :  { %v990_v45 = vmax.f32 %v4077_v31, 0.0  ;;  %v4209_v31 = vld [vmem:[#allocation20 + $0x30] sm:$0xff]   ;;  %v4210_v33 = vld [vmem:[#allocation20 + $0x38] sm:$0xff]  }
 0x310   :  { %v988_v47 = vmax.f32 %v4078_v37, 0.0  ;;  %v5115_v37 = vld [vmem:[#allocation19] sm:$0xff]  }
 0x311   :  { %v1000_v48 = vpack.c.bf16 %v990_v45, %v989_v38  ;;  %3610 = vmatpush3.bf16.msra.mxu1 %v998_v10  ;;  %v4194_v10 = vld [vmem:[#allocation17 + $0x38] sm:$0xff]   ;;  %v5118_v38 = vld [vmem:[#allocation19 + $0x8] sm:$0xff]   ;;  %v5124_v45 = vld [vmem:[#allocation19 + $0x10] sm:$0xff]  }
 0x312   :  { %v999_v49 = vpack.c.bf16 %v988_v47, %v987_v46  ;;  %v3601_v24 = vpop.f32.mrb[12].mxu0  ;;  %v5128_v46 = vld [vmem:[#allocation19 + $0x18] sm:$0xff]   ;;  %v5138_v47 = vpop.permute.xlu1 %1107 }
 0x313   :  { %v4079_v51 = vadd.f32 %v3601_v24, %v3073_v19  ;;  %v964_v52 = vpop.f32.mrb[13].mxu0  ;;  %5787 = vst [vmem:[#allocation41_spill] sm:$0xff] %v5138_v47 }
 0x314   :  { %v4080_v53 = vadd.f32 %v3073_v19, %v964_v52  ;;  %v3602_v58 = vpop.f32.mrb[14].mxu0  ;;  %3611 = vmatprep.subr.bf16.mxu1 %v999_v49 }
 0x315   :  { %v4081_v59 = vadd.f32 %v3602_v58, %v3073_v19  ;;  %v967_v60 = vpop.f32.mrb[15].mxu0  ;;  %3612 = vmatpush3.bf16.msra.mxu1 %v999_v49  ;;  %v993_v1 = vmax.f32 %v4079_v51, 0.0 }
 0x316   :  { %v4082_v61 = vadd.f32 %v3073_v19, %v967_v60  ;;  %3613 = vmatprep.subr.bf16.mxu1 %v1000_v48  ;;  %v991_v3 = vmax.f32 %v4080_v53, 0.0  ;;  %v4193_v19 = vld [vmem:[#allocation17 + $0x30] sm:$0xff]  }
 0x317   :  { %v994_v2 = vmax.f32 %v4081_v59, 0.0  ;;  %3647 = vmatprep.subr.bf16.mxu0 %v4193_v19 }
 0x318   :  { %v992_v4 = vmax.f32 %v4082_v61, 0.0  ;;  %3648 = vmatpush3.bf16.msra.mxu0 %v4193_v19 }
 0x319   :  { %v1002_v8 = vpack.c.bf16 %v994_v2, %v993_v1  ;;  %3614 = vmatpush3.bf16.msra.mxu1 %v1000_v48  ;;  %3649 = vmatprep.subr.bf16.mxu0 %v4194_v10  ;;  %v5142_v48 = vld [vmem:[#allocation19 + $0x28] sm:$0xff]  }
 0x31a   :  { %v1001_v9 = vpack.c.bf16 %v992_v4, %v991_v3 }
 0x31c   :  { %3615 = vmatprep.subr.bf16.mxu1 %v1001_v9  ;;  %3650 = vmatpush3.bf16.msra.mxu0 %v4194_v10 }
 0x31d   :  { %3616 = vmatpush3.bf16.msra.mxu1 %v1001_v9  ;;  %3667 = vmatprep.subr.bf16.mxu0 %v5112_v11 }
 0x31e   :  { %3617 = vmatprep.subr.bf16.mxu1 %v1002_v8 }
 0x321   :  { %3618 = vmatpush3.bf16.msra.mxu1 %v1002_v8 }
 0x322   :  { %3699 = vmatprep.subr.bf16.mxu1 %v4203_v13 }
 0x324   :  { %3620 = vmatmul.mubr.msk.bf16.vlgmr.msra.gmra.mrb[16].mxu1 %vm5062_vm3, %v5706_v41 }
 0x325   :  { %3623 = vmatprep.mubr.msk.bf16.mxu1 %vm5066_vm11, %v5706_v41  ;;  %3700 = vmatpush3.bf16.msra.mxu1 %v4203_v13 }
 0x326   :  { %3701 = vmatprep.subr.bf16.mxu1 %v4204_v14 }
 0x329   :  { %3702 = vmatpush3.bf16.msra.mxu1 %v4204_v14 }
 0x32a   :  { %3703 = vmatprep.subr.bf16.mxu1 %v4205_v20 }
 0x32c   :  { %3624 = vmatmul.mubr.msk.bf16.gmra.mrb[20].mxu1 %vm5070_vm5, %v5706_v41 }
 0x32d   :  { %3627 = vmatprep.mubr.msk.bf16.mxu1 %vm5074_vm4, %v5706_v41  ;;  %3704 = vmatpush3.bf16.msra.mxu1 %v4205_v20 }
 0x32e   :  { %3705 = vmatprep.subr.bf16.mxu1 %v4206_v22 }
 0x331   :  { %3706 = vmatpush3.bf16.msra.mxu1 %v4206_v22  ;;  %v4197_v22 = vld [vmem:[#allocation16 + $0x10] sm:$0xff]  }
 0x334   :  { %3628 = vmatmul.mubr.msk.bf16.gmra.mrb[24].mxu1 %vm5078_vm14, %v5706_v41 }
 0x335   :  { %3631 = vmatprep.mubr.msk.bf16.mxu1 %vm5082_vm13, %v5706_v41 }
 0x33c   :  { %3632 = vmatmul.mubr.msk.bf16.gmra.mrb[28].mxu1 %vm5086_vm8, %v5706_v41 }
 0x33d   :  { %3715 = vmatprep.mubr.bf16.mxu1 %v4955_v12  ;;  %v4207_v12 = vld [vmem:[#allocation20 + $0x20] sm:$0xff]  }
 0x33e   :  { %3707 = vmatprep.subr.bf16.mxu1 %v4207_v12 }
 0x33f   :  { %3708 = vmatpush3.bf16.msra.mxu1 %v4207_v12 }
 0x340   :  { %3709 = vmatprep.subr.bf16.mxu1 %v4208_v23 }
 0x343   :  { %3710 = vmatpush3.bf16.msra.mxu1 %v4208_v23 }
 0x344   :  { %3711 = vmatprep.subr.bf16.mxu1 %v4209_v31 }
 0x347   :  { %3712 = vmatpush3.bf16.msra.mxu1 %v4209_v31 }
 0x348   :  { %3713 = vmatprep.subr.bf16.mxu1 %v4210_v33 }
 0x34b   :  { %3714 = vmatpush3.bf16.msra.mxu1 %v4210_v33 }
 0x34c   :  { %3731 = vmatprep.subr.bf16.mxu1 %v5115_v37 }
 0x34e   :  { %3716 = vmatmul.mubr.bf16.vlgmr.msra.gmra.mrb[32].mxu1 %v4957_v15  ;;  %v5134_v15 = vld [vmem:[#allocation19 + $0x20] sm:$0xff]  }
 0x34f   :  { %3732 = vmatpush3.bf16.msra.mxu1 %v5115_v37  ;;  %3719 = vmatprep.mubr.bf16.mxu1 %v4961_v18  ;;  %v5136_v18 = vpop.permute.xlu0 %1102 }
 0x350   :  { %3733 = vmatprep.subr.bf16.mxu1 %v5118_v38 }
 0x353   :  { %3734 = vmatpush3.bf16.msra.mxu1 %v5118_v38 }
 0x354   :  { %3735 = vmatprep.subr.bf16.mxu1 %v5124_v45 }
 0x356   :  { %3720 = vmatmul.mubr.bf16.gmra.mrb[36].mxu1 %v4963_v21  ;;  %v5145_v21 = vpop.permute.xlu0 %1112 }
 0x357   :  { %3736 = vmatpush3.bf16.msra.mxu1 %v5124_v45  ;;  %3723 = vmatprep.mubr.bf16.mxu1 %v4967_v25  ;;  %v5149_v25 = vpop.permute.xlu1 %1117 }
 0x358   :  { %3737 = vmatprep.subr.bf16.mxu1 %v5128_v46 }
 0x35a   :  { %v5153_v49 = vpop.permute.xlu0 %1122 }
 0x35b   :  { %3738 = vmatpush3.bf16.msra.mxu1 %v5128_v46  ;;  %5788 = vst [vmem:[#allocation42_spill] sm:$0xff] %v5153_v49  ;;  %v5155_v24 = vpop.permute.xlu1 %1127 }
 0x35c   :  { %3739 = vmatprep.subr.bf16.mxu1 %v5134_v15  ;;  %5789 = vst [vmem:[#allocation43_spill] sm:$0xff] %v5155_v24 }
 0x35e   :  { %3724 = vmatmul.mubr.bf16.gmra.mrb[40].mxu1 %v4969_v28  ;;  %v5158_v28 = vpop.permute.xlu0 %1132 }
 0x35f   :  { %3740 = vmatpush3.bf16.msra.mxu1 %v5134_v15  ;;  %3727 = vmatprep.mubr.bf16.mxu1 %v4977_v35  ;;  %5790 = vst [vmem:[#allocation44_spill] sm:$0xff] %v5158_v28  ;;  %v5160_v53 = vpop.permute.xlu1 %1137 }
 0x360   :  { %3741 = vmatprep.subr.bf16.mxu1 %v5142_v48  ;;  %5791 = vst [vmem:[#allocation45_spill] sm:$0xff] %v5160_v53 }
 0x362   :  { %v5166_v4 = vpop.permute.xlu0 %1142 }
 0x363   :  { %3742 = vmatpush3.bf16.msra.mxu1 %v5142_v48  ;;  %5792 = vst [vmem:[#allocation46_spill] sm:$0xff] %v5166_v4  ;;  %v5168_v8 = vpop.permute.xlu1 %1147 }
 0x364   :  { %5793 = vst [vmem:[#allocation47_spill] sm:$0xff] %v5168_v8 }
 0x366   :  { %3728 = vmatmul.mubr.bf16.gmra.mrb[44].mxu1 %v4979_v39  ;;  %v4196_v39 = vld [vmem:[#allocation16 + $0x8] sm:$0xff]   ;;  %v5175_v31 = vpop.permute.xlu0 %1152 }
 0x367   :  { %5794 = vst [vmem:[#allocation48_spill] sm:$0xff] %v5175_v31 }
 0x3f7   :  { %v3621_v51 = vpop.f32.mrb[16].mxu1 }
 0x3f8   :  { %v1037_v52 = vpop.f32.mrb[17].mxu1  ;;  %v1182_v35 = vmul.f32 %v3621_v51, %v5145_v21  ;;  %v5177_v51 = vpop.permute.xlu1 %1157 }
 0x3f9   :  { %v3622_v58 = vpop.f32.mrb[18].mxu1  ;;  %v1180_v61 = vmul.f32 %v5136_v18, %v1037_v52  ;;  %5795 = vst [vmem:[#allocation49_spill] sm:$0xff] %v5177_v51 }
 0x3fa   :  { %v1183_v59 = vmul.f32 %v3622_v58, %v5149_v25  ;;  %v1040_v60 = vpop.f32.mrb[19].mxu1 }
 0x3fb   :  { %v1181_v1 = vmul.f32 %v5138_v47, %v1040_v60  ;;  %v5179_v60 = vpop.permute.xlu0 %1162 }
 0x3fc   :  { %v1197_v2 = vpack.c.bf16 %v1183_v59, %v1182_v35  ;;  %5796 = vst [vmem:[#allocation50_spill] sm:$0xff] %v5179_v60 }
 0x3fd   :  { %v1196_v3 = vpack.c.bf16 %v1181_v1, %v1180_v61 }
 0x3ff   :  { %v3625_v9 = vpop.f32.mrb[20].mxu1  ;;  %3651 = vmatprep.mubr.bf16.mxu0 %v1196_v3  ;;  %v4199_v3 = vld [vmem:[#allocation16 + $0x20] sm:$0xff]  }
 0x400   :  { %v1053_v19 = vpop.f32.mrb[21].mxu1  ;;  %3652 = vmatmul.mubr.bf16.vlgmr.msra.gmra.mrb[16].mxu0 %v1197_v2  ;;  %v1186_v13 = vmul.f32 %v3625_v9, %v5158_v28  ;;  %v5183_v9 = vpop.permute.xlu1 %1167 }
 0x401   :  { %v3626_v10 = vpop.f32.mrb[22].mxu1  ;;  %3668 = vmatpush3.bf16.msra.mxu0 %v5112_v11  ;;  %v1184_v12 = vmul.f32 %v5153_v49, %v1053_v19  ;;  %v4198_v11 = vld [vmem:[#allocation16 + $0x18] sm:$0xff]   ;;  %5797 = vst [vmem:[#allocation51_spill] sm:$0xff] %v5183_v9 }
 0x402   :  { %v1187_v14 = vmul.f32 %v3626_v10, %v5160_v53  ;;  %v1056_v20 = vpop.f32.mrb[23].mxu1  ;;  %3669 = vmatprep.subr.bf16.mxu0 %v4196_v39 }
 0x403   :  { %v1185_v23 = vmul.f32 %v5155_v24, %v1056_v20 }
 0x404   :  { %v1199_v33 = vpack.c.bf16 %v1187_v14, %v1186_v13  ;;  %v4200_v14 = vld [vmem:[#allocation16 + $0x28] sm:$0xff]  }
 0x405   :  { %v1198_v52 = vpack.c.bf16 %v1185_v23, %v1184_v12  ;;  %3670 = vmatpush3.bf16.msra.mxu0 %v4196_v39  ;;  %v5189_v23 = vpop.permute.xlu1 %1177 }
 0x406   :  { %3671 = vmatprep.subr.bf16.mxu0 %v4197_v22  ;;  %5799 = vst [vmem:[#allocation53_spill] sm:$0xff] %v5189_v23 }
 0x407   :  { %v3629_v58 = vpop.f32.mrb[24].mxu1  ;;  %3655 = vmatprep.mubr.bf16.mxu0 %v1198_v52 }
 0x408   :  { %v1069_v35 = vpop.f32.mrb[25].mxu1  ;;  %3656 = vmatmul.mubr.bf16.gmra.mrb[20].mxu0 %v1199_v33  ;;  %v1190_v61 = vmul.f32 %v3629_v58, %v5175_v31 }
 0x409   :  { %v3630_v59 = vpop.f32.mrb[26].mxu1  ;;  %3672 = vmatpush3.bf16.msra.mxu0 %v4197_v22  ;;  %v1188_v39 = vmul.f32 %v5166_v4, %v1069_v35  ;;  %v5187_v22 = vpop.permute.xlu0 %1172 }
 0x40a   :  { %v1191_v1 = vmul.f32 %v3630_v59, %v5177_v51  ;;  %v1072_v2 = vpop.f32.mrb[27].mxu1  ;;  %3673 = vmatprep.subr.bf16.mxu0 %v4198_v11  ;;  %5798 = vst [vmem:[#allocation52_spill] sm:$0xff] %v5187_v22  ;;  %v4201_v59 = vld [vmem:[#allocation16 + $0x30] sm:$0xff]  }
 0x40b   :  { %v1189_v19 = vmul.f32 %v5168_v8, %v1072_v2 }
 0x40c   :  { %v1201_v10 = vpack.c.bf16 %v1191_v1, %v1190_v61 }
 0x40d   :  { %v1200_v13 = vpack.c.bf16 %v1189_v19, %v1188_v39  ;;  %3674 = vmatpush3.bf16.msra.mxu0 %v4198_v11  ;;  %v4202_v39 = vld [vmem:[#allocation16 + $0x38] sm:$0xff]  }
 0x40e   :  { %3675 = vmatprep.subr.bf16.mxu0 %v4199_v3 }
 0x40f   :  { %v3633_v20 = vpop.f32.mrb[28].mxu1  ;;  %3659 = vmatprep.mubr.bf16.mxu0 %v1200_v13 }
 0x410   :  { %v1085_v12 = vpop.f32.mrb[29].mxu1  ;;  %3660 = vmatmul.mubr.bf16.gmra.mrb[24].mxu0 %v1201_v10  ;;  %v1194_v52 = vmul.f32 %v3633_v20, %v5187_v22 }
 0x411   :  { %v3634_v33 = vpop.f32.mrb[30].mxu1  ;;  %3676 = vmatpush3.bf16.msra.mxu0 %v4199_v3  ;;  %v1192_v11 = vmul.f32 %v5179_v60, %v1085_v12 }
 0x412   :  { %v1195_v58 = vmul.f32 %v3634_v33, %v5189_v23  ;;  %v1088_v35 = vpop.f32.mrb[31].mxu1  ;;  %3677 = vmatprep.subr.bf16.mxu0 %v4200_v14 }
 0x413   :  { %v1193_v61 = vmul.f32 %v5183_v9, %v1088_v35 }
 0x414   :  { %v1203_v1 = vpack.c.bf16 %v1195_v58, %v1194_v52 }
 0x415   :  { %v1202_v2 = vpack.c.bf16 %v1193_v61, %v1192_v11  ;;  %3678 = vmatpush3.bf16.msra.mxu0 %v4200_v14 }
 0x416   :  { %3679 = vmatprep.subr.bf16.mxu0 %v4201_v59 }
 0x417   :  { %3663 = vmatprep.mubr.bf16.mxu0 %v1202_v2 }
 0x418   :  { %3664 = vmatmul.mubr.bf16.gmra.mrb[28].mxu0 %v1203_v1 }
 0x419   :  { %3680 = vmatpush3.bf16.msra.mxu0 %v4201_v59  ;;  %3683 = vmatprep.mubr.bf16.mxu0 %v4931_v7  ;;  %v5206_v7 = vld [vmem:[#allocation19 + $0x30] sm:$0xff]  }
 0x41a   :  { %3681 = vmatprep.subr.bf16.mxu0 %v4202_v39  ;;  %3743 = vmatprep.subr.bf16.mxu1 %v5206_v7 }
 0x41b   :  { %3744 = vmatpush3.bf16.msra.mxu1 %v5206_v7 }
 0x41d   :  { %3682 = vmatpush3.bf16.msra.mxu0 %v4202_v39 }
 0x420   :  { %3684 = vmatmul.mubr.bf16.vlgmr.msra.gmra.mrb[16].mxu0 %v4934_v30  ;;  %v5210_v30 = vld [vmem:[#allocation19 + $0x38] sm:$0xff]  }
 0x421   :  { %3687 = vmatprep.mubr.bf16.mxu0 %v4936_v32  ;;  %3745 = vmatprep.subr.bf16.mxu1 %v5210_v30  ;;  %v5214_v32 = vpop.f32.mrb[32].mxu1 }
 0x422   :  { %3746 = vmatpush3.bf16.msra.mxu1 %v5210_v30 }
 0x428   :  { %3688 = vmatmul.mubr.bf16.gmra.mrb[20].mxu0 %v4940_v42  ;;  %v5216_v42 = vpop.f32.mrb[33].mxu1 }
 0x429   :  { %3691 = vmatprep.mubr.bf16.mxu0 %v4942_v44  ;;  %v5218_v44 = vpop.f32.mrb[34].mxu1 }
 0x430   :  { %3692 = vmatmul.mubr.bf16.gmra.mrb[24].mxu0 %v4946_v54  ;;  %v5220_v54 = vpop.f32.mrb[35].mxu1 }
 0x431   :  { %3695 = vmatprep.mubr.bf16.mxu0 %v4948_v56  ;;  %v5222_v56 = vpop.f32.mrb[36].mxu1 }
 0x438   :  { %3696 = vmatmul.mubr.bf16.gmra.mrb[28].mxu0 %v4952_v62  ;;  %v5224_v62 = vpop.f32.mrb[37].mxu1 }
 0x439   :  { %3779 = vmatprep.mubr.msk.bf16.mxu0 %vm4983_vm2, %v5706_v41  ;;  %v5226_v3 = vpop.f32.mrb[38].mxu1 }
 0x43a   :  { %v5228_v19 = vpop.f32.mrb[39].mxu1 }
 0x43b   :  { %v5230_v10 = vpop.f32.mrb[40].mxu1 }
 0x43c   :  { %v5232_v13 = vpop.f32.mrb[41].mxu1 }
 0x43d   :  { %v5234_v14 = vpop.f32.mrb[42].mxu1 }
 0x43e   :  { %v5236_v20 = vpop.f32.mrb[43].mxu1 }
 0x43f   :  { %v5238_v12 = vpop.f32.mrb[44].mxu1 }
 0x440   :  { %v5240_v33 = vpop.f32.mrb[45].mxu1 }
 0x441   :  { %v5242_v52 = vpop.f32.mrb[46].mxu1 }
 0x442   :  { %v5244_v58 = vpop.f32.mrb[47].mxu1 }
 0x4f3   :  { %v3685_v35 = vpop.f32.mrb[16].mxu0 }
 0x4f4   :  { %v1431_v59 = vpop.f32.mrb[17].mxu0  ;;  %v1496_v61 = vmax.f32 %v3685_v35, 0.0 }
 0x4f5   :  { %v3686_v11 = vpop.f32.mrb[18].mxu0  ;;  %v1494_v39 = vmax.f32 %v1431_v59, 0.0 }
 0x4f6   :  { %v1497_v1 = vmax.f32 %v3686_v11, 0.0  ;;  %v1434_v2 = vpop.f32.mrb[19].mxu0 }
 0x4f7   :  { %v1495_v41 = vmax.f32 %v1434_v2, 0.0 }
 0x4f8   :  { %v5246_v40 = vpack.c.bf16 %v1497_v1, %v1496_v61 }
 0x4f9   :  { %v5248_v9 = vpack.c.bf16 %v1495_v41, %v1494_v39 }
 0x4fa   :  { %5800 = vst [vmem:[#allocation54_spill] sm:$0xff] %v5246_v40 }
 0x4fb   :  { %5801 = vst [vmem:[#allocation55_spill] sm:$0xff] %v5248_v9  ;;  %v3689_v60 = vpop.f32.mrb[20].mxu0  ;;  %3747 = vmatprep.mubr.bf16.mxu1 %v5248_v9 }
 0x4fc   :  { %v1447_v23 = vpop.f32.mrb[21].mxu0  ;;  %3748 = vmatmul.mubr.bf16.vlgmr.msra.gmra.mrb[48].mxu1 %v5246_v40  ;;  %v1500_v8 = vmax.f32 %v3689_v60, 0.0 }
 0x4fd   :  { %v3690_v22 = vpop.f32.mrb[22].mxu0  ;;  %v1498_v31 = vmax.f32 %v1447_v23, 0.0 }
 0x4fe   :  { %v1501_v4 = vmax.f32 %v3690_v22, 0.0  ;;  %v1450_v51 = vpop.f32.mrb[23].mxu0 }
 0x4ff   :  { %v1499_v35 = vmax.f32 %v1450_v51, 0.0 }
 0x500   :  { %v5252_v11 = vpack.c.bf16 %v1501_v4, %v1500_v8 }
 0x501   :  { %v5254_v59 = vpack.c.bf16 %v1499_v35, %v1498_v31 }
 0x502   :  { %5802 = vst [vmem:[#allocation56_spill] sm:$0xff] %v5252_v11 }
 0x503   :  { %5803 = vst [vmem:[#allocation57_spill] sm:$0xff] %v5254_v59  ;;  %v3693_v61 = vpop.f32.mrb[24].mxu0  ;;  %3751 = vmatprep.mubr.bf16.mxu1 %v5254_v59 }
 0x504   :  { %v1463_v41 = vpop.f32.mrb[25].mxu0  ;;  %3752 = vmatmul.mubr.bf16.gmra.mrb[52].mxu1 %v5252_v11  ;;  %v1504_v2 = vmax.f32 %v3693_v61, 0.0 }
 0x505   :  { %v3694_v1 = vpop.f32.mrb[26].mxu0  ;;  %v1502_v9 = vmax.f32 %v1463_v41, 0.0 }
 0x506   :  { %v1505_v39 = vmax.f32 %v3694_v1, 0.0  ;;  %v1466_v40 = vpop.f32.mrb[27].mxu0 }
 0x507   :  { %v1503_v60 = vmax.f32 %v1466_v40, 0.0  ;;  %v5807_v40 = vmov 1.0|1.0  }
 0x508   :  { %v5258_v22 = vpack.c.bf16 %v1505_v39, %v1504_v2 }
 0x509   :  { %v5260_v23 = vpack.c.bf16 %v1503_v60, %v1502_v9 }
 0x50a   :  { %5804 = vst [vmem:[#allocation58_spill] sm:$0xff] %v5258_v22 }
 0x50b   :  { %v3697_v4 = vpop.f32.mrb[28].mxu0  ;;  %3755 = vmatprep.mubr.bf16.mxu1 %v5260_v23 }
 0x50c   :  { %v1479_v8 = vpop.f32.mrb[29].mxu0  ;;  %3756 = vmatmul.mubr.bf16.gmra.mrb[56].mxu1 %v5258_v22  ;;  %v1508_v51 = vmax.f32 %v3697_v4, 0.0 }
 0x50d   :  { %v3698_v31 = vpop.f32.mrb[30].mxu0  ;;  %v1506_v59 = vmax.f32 %v1479_v8, 0.0 }
 0x50e   :  { %v1509_v35 = vmax.f32 %v3698_v31, 0.0  ;;  %v1482_v11 = vpop.f32.mrb[31].mxu0 }
 0x50f   :  { %v1507_v61 = vmax.f32 %v1482_v11, 0.0 }
 0x510   :  { %v5264_v1 = vpack.c.bf16 %v1509_v35, %v1508_v51 }
 0x511   :  { %v5266_v41 = vpack.c.bf16 %v1507_v61, %v1506_v59 }
 0x512   :  { %5805 = vst [vmem:[#allocation59_spill] sm:$0xff] %v5264_v1 }
 0x513   :  { %5806 = vst [vmem:[#allocation60_spill] sm:$0xff] %v5266_v41  ;;  %3759 = vmatprep.mubr.bf16.mxu1 %v5266_v41 }
 0x514   :  { %3760 = vmatmul.mubr.bf16.gmra.mrb[60].mxu1 %v5264_v1 }
 0x515   :  { %3811 = vmatprep.mubr.msk.bf16.mxu1 %vm5055_vm15, %v5807_v40 }
 0x5cf   :  { %v3749_v9 = vpop.f32.mrb[48].mxu1 }
 0x5d0   :  { %v1816_v2 = vpop.f32.mrb[49].mxu1 }
 0x5d1   :  { %v3750_v39 = vpop.f32.mrb[50].mxu1 }
 0x5d2   :  { %v1880_v60 = vpack.c.bf16 %v3750_v39, %v3749_v9  ;;  %v1819_v4 = vpop.f32.mrb[51].mxu1 }
 0x5d3   :  { %v1879_v31 = vpack.c.bf16 %v1819_v4, %v1816_v2 }
 0x5d5   :  { %3763 = vmatprep.subr.bf16.mxu0 %v1879_v31 }
 0x5d6   :  { %3764 = vmatpush3.bf16.msra.mxu0 %v1879_v31 }
 0x5d7   :  { %v3753_v11 = vpop.f32.mrb[52].mxu1  ;;  %3765 = vmatprep.subr.bf16.mxu0 %v1880_v60 }
 0x5d8   :  { %v1832_v59 = vpop.f32.mrb[53].mxu1 }
 0x5d9   :  { %v3754_v8 = vpop.f32.mrb[54].mxu1 }
 0x5da   :  { %v1882_v51 = vpack.c.bf16 %v3754_v8, %v3753_v11  ;;  %v1835_v35 = vpop.f32.mrb[55].mxu1  ;;  %3766 = vmatpush3.bf16.msra.mxu0 %v1880_v60 }
 0x5db   :  { %v1881_v61 = vpack.c.bf16 %v1835_v35, %v1832_v59  ;;  %v5309_v59 = vld [vmem:[#allocation25 + $0x20] sm:$0xff]   ;;  %v5318_v35 = vld [vmem:[#allocation22] ss:$0 sm:$0xff] }
 0x5dd   :  { %3767 = vmatprep.subr.bf16.mxu0 %v1881_v61 }
 0x5de   :  { %3768 = vmatpush3.bf16.msra.mxu0 %v1881_v61  ;;  %v5322_v61 = vadd.f32 %v5214_v32, %v5318_v35 }
 0x5df   :  { %v3757_v50 = vpop.f32.mrb[56].mxu1  ;;  %3769 = vmatprep.subr.bf16.mxu0 %v1882_v51 }
 0x5e0   :  { %v1848_v1 = vpop.f32.mrb[57].mxu1  ;;  %5815 = vst [vmem:[#allocation62_spill] sm:$0xff] %v5322_v61 }
 0x5e1   :  { %v3758_v41 = vpop.f32.mrb[58].mxu1 }
 0x5e2   :  { %v1884_v22 = vpack.c.bf16 %v3758_v41, %v3757_v50  ;;  %v1851_v9 = vpop.f32.mrb[59].mxu1  ;;  %3770 = vmatpush3.bf16.msra.mxu0 %v1882_v51  ;;  %v5294_v50 = vld [vmem:[#allocation25] sm:$0xff]   ;;  %v5305_v41 = vld [vmem:[#allocation25 + $0x18] sm:$0xff]   ;;  %v5313_v51 = vld [vmem:[#allocation25 + $0x28] sm:$0xff]  }
 0x5e3   :  { %v1883_v2 = vpack.c.bf16 %v1851_v9, %v1848_v1  ;;  %v5301_v1 = vld [vmem:[#allocation25 + $0x10] sm:$0xff]   ;;  %5814 = vst [vmem:[#allocation61_spill] sm:$0xff] %v5313_v51  ;;  %v5326_v9 = vadd.f32 %v5318_v35, %v5216_v42 }
 0x5e5   :  { %3771 = vmatprep.subr.bf16.mxu0 %v1883_v2  ;;  %5816 = vst [vmem:[#allocation63_spill] sm:$0xff] %v5326_v9 }
 0x5e6   :  { %3772 = vmatpush3.bf16.msra.mxu0 %v1883_v2 }
 0x5e7   :  { %v3761_v39 = vpop.f32.mrb[60].mxu1  ;;  %3773 = vmatprep.subr.bf16.mxu0 %v1884_v22 }
 0x5e8   :  { %v1864_v4 = vpop.f32.mrb[61].mxu1 }
 0x5e9   :  { %v3762_v31 = vpop.f32.mrb[62].mxu1 }
 0x5ea   :  { %v1886_v11 = vpack.c.bf16 %v3762_v31, %v3761_v39  ;;  %v1867_v8 = vpop.f32.mrb[63].mxu1  ;;  %3774 = vmatpush3.bf16.msra.mxu0 %v1884_v22  ;;  %v5296_v22 = vld [vmem:[#allocation25 + $0x8] sm:$0xff]   ;;  %v5330_v39 = vadd.f32 %v5218_v44, %v5318_v35 }
 0x5eb   :  { %v1885_v60 = vpack.c.bf16 %v1867_v8, %v1864_v4  ;;  %v5840_v26 = vld [vmem:[#allocation61_spill] sm:$0xff] }
 0x5ed   :  { %3775 = vmatprep.subr.bf16.mxu0 %v1885_v60 }
 0x5ee   :  { %3776 = vmatpush3.bf16.msra.mxu0 %v1885_v60 }
 0x5ef   :  { %3777 = vmatprep.subr.bf16.mxu0 %v1886_v11 }
 0x5f2   :  { %3778 = vmatpush3.bf16.msra.mxu0 %v1886_v11  ;;  %v5335_v11 = vadd.f32 %v5318_v35, %v5220_v54  ;;  %v5346_v54 = vadd.f32 %v5318_v35, %v5224_v62 }
 0x5f3   :  { %3827 = vmatprep.subr.bf16.mxu0 %v5294_v50 }
 0x5f5   :  { %3780 = vmatmul.mubr.msk.bf16.vlgmr.msra.gmra.mrb[32].mxu0 %vm4995_vm7, %v5807_v40 }
 0x5f6   :  { %3783 = vmatprep.mubr.msk.bf16.mxu0 %vm5808_vm6, %v5807_v40  ;;  %3828 = vmatpush3.bf16.msra.mxu0 %v5294_v50 }
 0x5f7   :  { %3829 = vmatprep.subr.bf16.mxu0 %v5296_v22 }
 0x5fa   :  { %3830 = vmatpush3.bf16.msra.mxu0 %v5296_v22 }
 0x5fb   :  { %3831 = vmatprep.subr.bf16.mxu0 %v5301_v1 }
 0x5fd   :  { %3784 = vmatmul.mubr.msk.bf16.gmra.mrb[36].mxu0 %vm5809_vm9, %v5807_v40 }
 0x5fe   :  { %3787 = vmatprep.mubr.msk.bf16.mxu0 %vm5810_vm10, %v5807_v40  ;;  %3832 = vmatpush3.bf16.msra.mxu0 %v5301_v1 }
 0x5ff   :  { %3833 = vmatprep.subr.bf16.mxu0 %v5305_v41 }
 0x602   :  { %3834 = vmatpush3.bf16.msra.mxu0 %v5305_v41 }
 0x603   :  { %3835 = vmatprep.subr.bf16.mxu0 %v5309_v59 }
 0x605   :  { %3788 = vmatmul.mubr.msk.bf16.gmra.mrb[40].mxu0 %vm5811_vm12, %v5807_v40 }
 0x606   :  { %3791 = vmatprep.mubr.msk.bf16.mxu0 %vm5812_vm0, %v5807_v40  ;;  %3836 = vmatpush3.bf16.msra.mxu0 %v5309_v59 }
 0x607   :  { %3837 = vmatprep.subr.bf16.mxu0 %v5313_v51 }
 0x60a   :  { %3838 = vmatpush3.bf16.msra.mxu0 %v5313_v51 }
 0x60d   :  { %3792 = vmatmul.mubr.msk.bf16.gmra.mrb[44].mxu0 %vm5813_vm1, %v5807_v40 }
 0x6c8   :  { %v3781_v2 = vpop.f32.mrb[32].mxu0 }
 0x6c9   :  { %v1930_v4 = vadd.f32 %v3781_v2, %v5322_v61  ;;  %v1921_v31 = vpop.f32.mrb[33].mxu0  ;;  %v5342_v2 = vadd.f32 %v5222_v56, %v5318_v35 }
 0x6ca   :  { %v1922_v8 = vadd.f32 %v1921_v31, %v5326_v9  ;;  %v3782_v32 = vpop.f32.mrb[34].mxu0 }
 0x6cb   :  { %v1933_v60 = vadd.f32 %v3782_v32, %v5330_v39  ;;  %v1924_v43 = vpop.f32.mrb[35].mxu0  ;;  %v1986_v51 = vmax.f32 %v1930_v4, 0.0  ;;  %v5350_v32 = vadd.f32 %v5226_v3, %v5318_v35 }
 0x6cc   :  { %v1925_v42 = vadd.f32 %v1924_v43, %v5335_v11  ;;  %v1984_v34 = vmax.f32 %v1922_v8, 0.0  ;;  %v5355_v8 = vadd.f32 %v5318_v35, %v5228_v19 }
 0x6cd   :  { %v1987_v36 = vmax.f32 %v1933_v60, 0.0  ;;  %5817 = vst [vmem:[#allocation64_spill] sm:$0xff] %v5350_v32 }
 0x6ce   :  { %v1985_v44 = vmax.f32 %v1925_v42, 0.0 }
 0x6cf   :  { %v2001_v61 = vpack.c.bf16 %v1987_v36, %v1986_v51 }
 0x6d0   :  { %v2000_v31 = vpack.c.bf16 %v1985_v44, %v1984_v34  ;;  %v3785_v9 = vpop.f32.mrb[36].mxu0  ;;  %v5362_v44 = vadd.f32 %v5230_v10, %v5318_v35 }
 0x6d1   :  { %v1946_v43 = vadd.f32 %v3785_v9, %v5342_v2  ;;  %v1937_v4 = vpop.f32.mrb[37].mxu0 }
 0x6d2   :  { %v1938_v56 = vadd.f32 %v1937_v4, %v5346_v54  ;;  %v3786_v36 = vpop.f32.mrb[38].mxu0  ;;  %3795 = vmatprep.subr.bf16.mxu1 %v2000_v31  ;;  %v5366_v4 = vadd.f32 %v5318_v35, %v5232_v13 }
 0x6d3   :  { %v1949_v62 = vadd.f32 %v3786_v36, %v5350_v32  ;;  %v1940_v51 = vpop.f32.mrb[39].mxu0  ;;  %3796 = vmatpush3.bf16.msra.mxu1 %v2000_v31  ;;  %v1990_v3 = vmax.f32 %v1946_v43, 0.0  ;;  %v5370_v31 = vadd.f32 %v5234_v14, %v5318_v35 }
 0x6d4   :  { %v1941_v34 = vadd.f32 %v1940_v51, %v5355_v8  ;;  %3797 = vmatprep.subr.bf16.mxu1 %v2001_v61  ;;  %v1988_v42 = vmax.f32 %v1938_v56, 0.0 }
 0x6d5   :  { %v1991_v60 = vmax.f32 %v1949_v62, 0.0  ;;  %v5375_v62 = vadd.f32 %v5318_v35, %v5236_v20 }
 0x6d6   :  { %v1989_v9 = vmax.f32 %v1941_v34, 0.0 }
 0x6d7   :  { %v2003_v19 = vpack.c.bf16 %v1991_v60, %v1990_v3  ;;  %3798 = vmatpush3.bf16.msra.mxu1 %v2001_v61 }
 0x6d8   :  { %v2002_v36 = vpack.c.bf16 %v1989_v9, %v1988_v42  ;;  %v3789_v32 = vpop.f32.mrb[40].mxu0  ;;  %v5382_v42 = vadd.f32 %v5238_v12, %v5318_v35  ;;  %v5386_v9 = vadd.f32 %v5318_v35, %v5240_v33 }
 0x6d9   :  { %v1962_v43 = vadd.f32 %v3789_v32, %v5362_v44  ;;  %v1953_v56 = vpop.f32.mrb[41].mxu0 }
 0x6da   :  { %v1954_v10 = vadd.f32 %v1953_v56, %v5366_v4  ;;  %v3790_v61 = vpop.f32.mrb[42].mxu0  ;;  %3799 = vmatprep.subr.bf16.mxu1 %v2002_v36 }
 0x6db   :  { %v1965_v13 = vadd.f32 %v3790_v61, %v5370_v31  ;;  %v1956_v51 = vpop.f32.mrb[43].mxu0  ;;  %3800 = vmatpush3.bf16.msra.mxu1 %v2002_v36  ;;  %v1994_v14 = vmax.f32 %v1962_v43, 0.0  ;;  %v5390_v36 = vadd.f32 %v5242_v52, %v5318_v35 }
 0x6dc   :  { %v1957_v34 = vadd.f32 %v1956_v51, %v5375_v62  ;;  %3801 = vmatprep.subr.bf16.mxu1 %v2003_v19  ;;  %v1992_v60 = vmax.f32 %v1954_v10, 0.0 }
 0x6dd   :  { %v1995_v3 = vmax.f32 %v1965_v13, 0.0  ;;  %v5395_v13 = vadd.f32 %v5318_v35, %v5244_v58 }
 0x6de   :  { %v1993_v32 = vmax.f32 %v1957_v34, 0.0 }
 0x6df   :  { %v2005_v20 = vpack.c.bf16 %v1995_v3, %v1994_v14  ;;  %3802 = vmatpush3.bf16.msra.mxu1 %v2003_v19 }
 0x6e0   :  { %v2004_v56 = vpack.c.bf16 %v1993_v32, %v1992_v60  ;;  %v3793_v61 = vpop.f32.mrb[44].mxu0 }
 0x6e1   :  { %v1978_v43 = vadd.f32 %v3793_v61, %v5382_v42  ;;  %v1969_v10 = vpop.f32.mrb[45].mxu0 }
 0x6e2   :  { %v1970_v12 = vadd.f32 %v1969_v10, %v5386_v9  ;;  %v3794_v19 = vpop.f32.mrb[46].mxu0  ;;  %3803 = vmatprep.subr.bf16.mxu1 %v2004_v56  ;;  %v5452_v10 = vld [vmem:[#allocation23 + $0x8] sm:$0xff]  }
 0x6e3   :  { %v1981_v33 = vadd.f32 %v3794_v19, %v5390_v36  ;;  %v1972_v51 = vpop.f32.mrb[47].mxu0  ;;  %3804 = vmatpush3.bf16.msra.mxu1 %v2004_v56  ;;  %v1998_v52 = vmax.f32 %v1978_v43, 0.0 }
 0x6e4   :  { %v1973_v34 = vadd.f32 %v1972_v51, %v5395_v13  ;;  %3805 = vmatprep.subr.bf16.mxu1 %v2005_v20  ;;  %v1996_v3 = vmax.f32 %v1970_v12, 0.0 }
 0x6e5   :  { %v1999_v14 = vmax.f32 %v1981_v33, 0.0 }
 0x6e6   :  { %v1997_v60 = vmax.f32 %v1973_v34, 0.0 }
 0x6e7   :  { %v2007_v32 = vpack.c.bf16 %v1999_v14, %v1998_v52  ;;  %3806 = vmatpush3.bf16.msra.mxu1 %v2005_v20  ;;  %v5458_v14 = vld [vmem:[#allocation23 + $0x10] sm:$0xff]  }
 0x6e8   :  { %v2006_v61 = vpack.c.bf16 %v1997_v60, %v1996_v3 }
 0x6ea   :  { %3807 = vmatprep.subr.bf16.mxu1 %v2006_v61 }
 0x6eb   :  { %3808 = vmatpush3.bf16.msra.mxu1 %v2006_v61 }
 0x6ec   :  { %3809 = vmatprep.subr.bf16.mxu1 %v2007_v32 }
 0x6ef   :  { %3810 = vmatpush3.bf16.msra.mxu1 %v2007_v32 }
 0x6f0   :  { %3891 = vmatprep.subr.bf16.mxu1 %v5115_v37 }
 0x6f2   :  { %3812 = vmatmul.mubr.msk.bf16.vlgmr.msra.gmra.mrb[64].mxu1 %vm5062_vm3, %v5807_v40 }
 0x6f3   :  { %3815 = vmatprep.mubr.msk.bf16.mxu1 %vm5066_vm11, %v5807_v40  ;;  %3892 = vmatpush3.bf16.msra.mxu1 %v5115_v37  ;;  %v5437_v37 = vld [vmem:[#allocation25 + $0x30] sm:$0xff]  }
 0x6f4   :  { %3893 = vmatprep.subr.bf16.mxu1 %v5118_v38  ;;  %3839 = vmatprep.subr.bf16.mxu0 %v5437_v37 }
 0x6f5   :  { %3840 = vmatpush3.bf16.msra.mxu0 %v5437_v37 }
 0x6f7   :  { %3894 = vmatpush3.bf16.msra.mxu1 %v5118_v38  ;;  %v5441_v38 = vld [vmem:[#allocation25 + $0x38] sm:$0xff]  }
 0x6f8   :  { %3895 = vmatprep.subr.bf16.mxu1 %v5124_v45  ;;  %3841 = vmatprep.subr.bf16.mxu0 %v5441_v38 }
 0x6f9   :  { %3842 = vmatpush3.bf16.msra.mxu0 %v5441_v38 }
 0x6fa   :  { %3816 = vmatmul.mubr.msk.bf16.gmra.mrb[68].mxu1 %vm5070_vm5, %v5807_v40 }
 0x6fb   :  { %3819 = vmatprep.mubr.msk.bf16.mxu1 %vm5074_vm4, %v5807_v40  ;;  %3896 = vmatpush3.bf16.msra.mxu1 %v5124_v45  ;;  %v5445_v45 = vld [vmem:[#allocation23] sm:$0xff]  }
 0x6fc   :  { %3897 = vmatprep.subr.bf16.mxu1 %v5128_v46  ;;  %3859 = vmatprep.subr.bf16.mxu0 %v5445_v45 }
 0x6ff   :  { %3898 = vmatpush3.bf16.msra.mxu1 %v5128_v46 }
 0x700   :  { %3899 = vmatprep.subr.bf16.mxu1 %v5134_v15 }
 0x702   :  { %3820 = vmatmul.mubr.msk.bf16.gmra.mrb[72].mxu1 %vm5078_vm14, %v5807_v40 }
 0x703   :  { %3823 = vmatprep.mubr.msk.bf16.mxu1 %vm5082_vm13, %v5807_v40  ;;  %3900 = vmatpush3.bf16.msra.mxu1 %v5134_v15 }
 0x704   :  { %3901 = vmatprep.subr.bf16.mxu1 %v5142_v48 }
 0x707   :  { %3902 = vmatpush3.bf16.msra.mxu1 %v5142_v48 }
 0x708   :  { %3903 = vmatprep.subr.bf16.mxu1 %v5206_v7 }
 0x70a   :  { %3824 = vmatmul.mubr.msk.bf16.gmra.mrb[76].mxu1 %vm5086_vm8, %v5807_v40 }
 0x70b   :  { %3904 = vmatpush3.bf16.msra.mxu1 %v5206_v7 }
 0x70c   :  { %3905 = vmatprep.subr.bf16.mxu1 %v5210_v30 }
 0x70f   :  { %3906 = vmatpush3.bf16.msra.mxu1 %v5210_v30 }
 0x7c5   :  { %v3813_v46 = vpop.f32.mrb[64].mxu1 }
 0x7c6   :  { %v2042_v15 = vpop.f32.mrb[65].mxu1  ;;  %v2107_v7 = vmul.f32 %v3813_v46, %v5145_v21  ;;  %v5464_v46 = vld [vmem:[#allocation23 + $0x18] sm:$0xff]  }
 0x7c7   :  { %v3814_v48 = vpop.f32.mrb[66].mxu1  ;;  %v2105_v35 = vmul.f32 %v2042_v15, %v5136_v18 }
 0x7c8   :  { %v2108_v30 = vmul.f32 %v3814_v48, %v5149_v25  ;;  %v2045_v58 = vpop.f32.mrb[67].mxu1 }
 0x7c9   :  { %v2106_v20 = vmul.f32 %v2045_v58, %v5138_v47 }
 0x7ca   :  { %v2122_v56 = vpack.c.bf16 %v2108_v30, %v2107_v7  ;;  %v5818_v30 = vld [vmem:[#allocation48_spill] sm:$0xff] }
 0x7cb   :  { %v2121_v43 = vpack.c.bf16 %v2106_v20, %v2105_v35  ;;  %v5819_v35 = vld [vmem:[#allocation49_spill] sm:$0xff] }
 0x7cd   :  { %v3817_v12 = vpop.f32.mrb[68].mxu1  ;;  %3843 = vmatprep.mubr.bf16.mxu0 %v2121_v43  ;;  %v5470_v43 = vld [vmem:[#allocation23 + $0x20] sm:$0xff]  }
 0x7ce   :  { %v2058_v19 = vpop.f32.mrb[69].mxu1  ;;  %3844 = vmatmul.mubr.bf16.vlgmr.msra.gmra.mrb[48].mxu0 %v2122_v56  ;;  %v2111_v51 = vmul.f32 %v3817_v12, %v5158_v28  ;;  %v5820_v12 = vld [vmem:[#allocation46_spill] sm:$0xff] }
 0x7cf   :  { %v3818_v33 = vpop.f32.mrb[70].mxu1  ;;  %3860 = vmatpush3.bf16.msra.mxu0 %v5445_v45  ;;  %v2109_v3 = vmul.f32 %v2058_v19, %v5153_v49 }
 0x7d0   :  { %v2112_v34 = vmul.f32 %v3818_v33, %v5160_v53  ;;  %v2061_v52 = vpop.f32.mrb[71].mxu1  ;;  %3861 = vmatprep.subr.bf16.mxu0 %v5452_v10  ;;  %v5821_v33 = vld [vmem:[#allocation47_spill] sm:$0xff] }
 0x7d1   :  { %v2110_v60 = vmul.f32 %v2061_v52, %v5155_v24 }
 0x7d2   :  { %v2124_v32 = vpack.c.bf16 %v2112_v34, %v2111_v51 }
 0x7d3   :  { %v2123_v61 = vpack.c.bf16 %v2110_v60, %v2109_v3  ;;  %3862 = vmatpush3.bf16.msra.mxu0 %v5452_v10  ;;  %v5476_v3 = vld [vmem:[#allocation23 + $0x28] sm:$0xff]  }
 0x7d4   :  { %3863 = vmatprep.subr.bf16.mxu0 %v5458_v14 }
 0x7d5   :  { %v3821_v15 = vpop.f32.mrb[72].mxu1  ;;  %3847 = vmatprep.mubr.bf16.mxu0 %v2123_v61 }
 0x7d6   :  { %v2074_v48 = vpop.f32.mrb[73].mxu1  ;;  %3848 = vmatmul.mubr.bf16.gmra.mrb[52].mxu0 %v2124_v32  ;;  %v2115_v58 = vmul.f32 %v3821_v15, %v5818_v30  ;;  %v5822_v15 = vld [vmem:[#allocation52_spill] sm:$0xff] }
 0x7d7   :  { %v3822_v7 = vpop.f32.mrb[74].mxu1  ;;  %3864 = vmatpush3.bf16.msra.mxu0 %v5458_v14  ;;  %v2113_v19 = vmul.f32 %v2074_v48, %v5820_v12  ;;  %v5823_v48 = vld [vmem:[#allocation53_spill] sm:$0xff] }
 0x7d8   :  { %v2116_v20 = vmul.f32 %v3822_v7, %v5819_v35  ;;  %v2077_v56 = vpop.f32.mrb[75].mxu1  ;;  %3865 = vmatprep.subr.bf16.mxu0 %v5464_v46 }
 0x7d9   :  { %v2114_v51 = vmul.f32 %v2077_v56, %v5821_v33 }
 0x7da   :  { %v2126_v34 = vpack.c.bf16 %v2116_v20, %v2115_v58  ;;  %v5482_v58 = vld [vmem:[#allocation23 + $0x30] sm:$0xff]  }
 0x7db   :  { %v2125_v52 = vpack.c.bf16 %v2114_v51, %v2113_v19  ;;  %3866 = vmatpush3.bf16.msra.mxu0 %v5464_v46  ;;  %v5824_v20 = vld [vmem:[#allocation50_spill] sm:$0xff]  ;;  %v5825_v51 = vld [vmem:[#allocation51_spill] sm:$0xff] }
 0x7dc   :  { %3867 = vmatprep.subr.bf16.mxu0 %v5470_v43 }
 0x7dd   :  { %v3825_v60 = vpop.f32.mrb[76].mxu1  ;;  %3851 = vmatprep.mubr.bf16.mxu0 %v2125_v52 }
 0x7de   :  { %v2090_v32 = vpop.f32.mrb[77].mxu1  ;;  %3852 = vmatmul.mubr.bf16.gmra.mrb[56].mxu0 %v2126_v34  ;;  %v2119_v7 = vmul.f32 %v3825_v60, %v5822_v15  ;;  %v5488_v34 = vld [vmem:[#allocation23 + $0x38] sm:$0xff]  }
 0x7df   :  { %v3826_v61 = vpop.f32.mrb[78].mxu1  ;;  %3868 = vmatpush3.bf16.msra.mxu0 %v5470_v43  ;;  %v2117_v19 = vmul.f32 %v2090_v32, %v5824_v20  ;;  %v5826_v60 = vld [vmem:[#allocation55_spill] sm:$0xff]  ;;  %v5827_v32 = vld [vmem:[#allocation54_spill] sm:$0xff] }
 0x7e0   :  { %v2120_v12 = vmul.f32 %v3826_v61, %v5823_v48  ;;  %v2093_v56 = vpop.f32.mrb[79].mxu1  ;;  %3869 = vmatprep.subr.bf16.mxu0 %v5476_v3  ;;  %v5830_v61 = vld [vmem:[#allocation58_spill] sm:$0xff] }
 0x7e1   :  { %v2118_v33 = vmul.f32 %v2093_v56, %v5825_v51 }
 0x7e2   :  { %v2128_v35 = vpack.c.bf16 %v2120_v12, %v2119_v7  ;;  %v5828_v12 = vld [vmem:[#allocation57_spill] sm:$0xff]  ;;  %v5831_v7 = vld [vmem:[#allocation60_spill] sm:$0xff] }
 0x7e3   :  { %v2127_v52 = vpack.c.bf16 %v2118_v33, %v2117_v19  ;;  %3870 = vmatpush3.bf16.msra.mxu0 %v5476_v3  ;;  %v5829_v33 = vld [vmem:[#allocation56_spill] sm:$0xff] }
 0x7e4   :  { %3871 = vmatprep.subr.bf16.mxu0 %v5482_v58 }
 0x7e5   :  { %3855 = vmatprep.mubr.bf16.mxu0 %v2127_v52 }
 0x7e6   :  { %3856 = vmatmul.mubr.bf16.gmra.mrb[60].mxu0 %v2128_v35  ;;  %v5832_v35 = vld [vmem:[#allocation59_spill] sm:$0xff] }
 0x7e7   :  { %3872 = vmatpush3.bf16.msra.mxu0 %v5482_v58  ;;  %3875 = vmatprep.mubr.bf16.mxu0 %v5826_v60 }
 0x7e8   :  { %3873 = vmatprep.subr.bf16.mxu0 %v5488_v34 }
 0x7eb   :  { %3874 = vmatpush3.bf16.msra.mxu0 %v5488_v34 }
 0x7ee   :  { %3876 = vmatmul.mubr.bf16.vlgmr.msra.gmra.mrb[48].mxu0 %v5827_v32 }
 0x7ef   :  { %3879 = vmatprep.mubr.bf16.mxu0 %v5828_v12 }
 0x7f6   :  { %3880 = vmatmul.mubr.bf16.gmra.mrb[52].mxu0 %v5829_v33 }
 0x7f7   :  { %3883 = vmatprep.mubr.bf16.mxu0 %v5260_v23 }
 0x7fe   :  { %3884 = vmatmul.mubr.bf16.gmra.mrb[56].mxu0 %v5830_v61 }
 0x7ff   :  { %3887 = vmatprep.mubr.bf16.mxu0 %v5831_v7 }
 0x806   :  { %3888 = vmatmul.mubr.bf16.gmra.mrb[60].mxu0 %v5832_v35 }
 0x807   :  { %3971 = vmatprep.mubr.msk.bf16.mxu0 %vm5055_vm15, %v5807_v40 }
 0x8c1   :  { %v3877_v19 = vpop.f32.mrb[48].mxu0 }
 0x8c2   :  { %v2356_v52 = vpop.f32.mrb[49].mxu0  ;;  %v2421_v32 = vmax.f32 %v3877_v19, 0.0 }
 0x8c3   :  { %v3878_v60 = vpop.f32.mrb[50].mxu0  ;;  %v2419_v20 = vmax.f32 %v2356_v52, 0.0 }
 0x8c4   :  { %v2422_v51 = vmax.f32 %v3878_v60, 0.0  ;;  %v2359_v12 = vpop.f32.mrb[51].mxu0 }
 0x8c5   :  { %v2420_v33 = vmax.f32 %v2359_v12, 0.0 }
 0x8c6   :  { %v5504_v48 = vpack.c.bf16 %v2422_v51, %v2421_v32 }
 0x8c7   :  { %v5506_v23 = vpack.c.bf16 %v2420_v33, %v2419_v20 }
 0x8c9   :  { %v3881_v61 = vpop.f32.mrb[52].mxu0  ;;  %3907 = vmatprep.mubr.bf16.mxu1 %v5506_v23 }
 0x8ca   :  { %v2372_v7 = vpop.f32.mrb[53].mxu0  ;;  %3908 = vmatmul.mubr.bf16.vlgmr.msra.gmra.mrb[80].mxu1 %v5504_v48  ;;  %v2425_v56 = vmax.f32 %v3881_v61, 0.0 }
 0x8cb   :  { %v3882_v35 = vpop.f32.mrb[54].mxu0  ;;  %v2423_v24 = vmax.f32 %v2372_v7, 0.0 }
 0x8cc   :  { %v2426_v15 = vmax.f32 %v3882_v35, 0.0  ;;  %v2375_v30 = vpop.f32.mrb[55].mxu0 }
 0x8cd   :  { %v2424_v19 = vmax.f32 %v2375_v30, 0.0 }
 0x8ce   :  { %v5510_v60 = vpack.c.bf16 %v2426_v15, %v2425_v56 }
 0x8cf   :  { %v5512_v52 = vpack.c.bf16 %v2424_v19, %v2423_v24 }
 0x8d1   :  { %v3885_v51 = vpop.f32.mrb[56].mxu0  ;;  %3911 = vmatprep.mubr.bf16.mxu1 %v5512_v52 }
 0x8d2   :  { %v2388_v20 = vpop.f32.mrb[57].mxu0  ;;  %3912 = vmatmul.mubr.bf16.gmra.mrb[84].mxu1 %v5510_v60  ;;  %v2429_v12 = vmax.f32 %v3885_v51, 0.0 }
 0x8d3   :  { %v3886_v32 = vpop.f32.mrb[58].mxu0  ;;  %v2427_v53 = vmax.f32 %v2388_v20, 0.0 }
 0x8d4   :  { %v2430_v33 = vmax.f32 %v3886_v32, 0.0  ;;  %v2391_v49 = vpop.f32.mrb[59].mxu0 }
 0x8d5   :  { %v2428_v61 = vmax.f32 %v2391_v49, 0.0 }
 0x8d6   :  { %v5516_v35 = vpack.c.bf16 %v2430_v33, %v2429_v12 }
 0x8d7   :  { %v5518_v7 = vpack.c.bf16 %v2428_v61, %v2427_v53 }
 0x8d8   :  { %5834 = vst [vmem:[#allocation55_spill] sm:$0xff] %v5516_v35 }
 0x8d9   :  { %v3889_v30 = vpop.f32.mrb[60].mxu0  ;;  %3915 = vmatprep.mubr.bf16.mxu1 %v5518_v7 }
 0x8da   :  { %v2404_v24 = vpop.f32.mrb[61].mxu0  ;;  %3916 = vmatmul.mubr.bf16.gmra.mrb[88].mxu1 %v5516_v35  ;;  %v2433_v56 = vmax.f32 %v3889_v30, 0.0 }
 0x8db   :  { %v3890_v15 = vpop.f32.mrb[62].mxu0  ;;  %v2431_v47 = vmax.f32 %v2404_v24, 0.0 }
 0x8dc   :  { %v2434_v19 = vmax.f32 %v3890_v15, 0.0  ;;  %v2407_v28 = vpop.f32.mrb[63].mxu0 }
 0x8dd   :  { %v2432_v51 = vmax.f32 %v2407_v28, 0.0 }
 0x8de   :  { %v5522_v32 = vpack.c.bf16 %v2434_v19, %v2433_v56 }
 0x8df   :  { %v5524_v20 = vpack.c.bf16 %v2432_v51, %v2431_v47 }
 0x8e0   :  { %5835 = vst [vmem:[#allocation54_spill] sm:$0xff] %v5522_v32 }
 0x8e1   :  { %5836 = vst [vmem:[#allocation57_spill] sm:$0xff] %v5524_v20  ;;  %3919 = vmatprep.mubr.bf16.mxu1 %v5524_v20 }
 0x8e2   :  { %3920 = vmatmul.mubr.bf16.gmra.mrb[92].mxu1 %v5522_v32 }
 0x8e3   :  { %3939 = vmatprep.mubr.msk.bf16.mxu1 %vm4983_vm2, %v5807_v40 }
 0x99d   :  { %v3909_v53 = vpop.f32.mrb[80].mxu1 }
 0x99e   :  { %v2477_v12 = vpop.f32.mrb[81].mxu1 }
 0x99f   :  { %v3910_v33 = vpop.f32.mrb[82].mxu1 }
 0x9a0   :  { %v2541_v61 = vpack.c.bf16 %v3910_v33, %v3909_v53  ;;  %v2480_v30 = vpop.f32.mrb[83].mxu1 }
 0x9a1   :  { %v2540_v15 = vpack.c.bf16 %v2480_v30, %v2477_v12 }
 0x9a3   :  { %3923 = vmatprep.subr.bf16.mxu1 %v2540_v15 }
 0x9a4   :  { %3924 = vmatpush3.bf16.msra.mxu1 %v2540_v15 }
 0x9a5   :  { %v3913_v28 = vpop.f32.mrb[84].mxu1  ;;  %3925 = vmatprep.subr.bf16.mxu1 %v2541_v61 }
 0x9a6   :  { %v2493_v47 = vpop.f32.mrb[85].mxu1 }
 0x9a7   :  { %v3914_v24 = vpop.f32.mrb[86].mxu1 }
 0x9a8   :  { %v2543_v56 = vpack.c.bf16 %v3914_v24, %v3913_v28  ;;  %v2496_v19 = vpop.f32.mrb[87].mxu1  ;;  %3926 = vmatpush3.bf16.msra.mxu1 %v2541_v61 }
 0x9a9   :  { %v2542_v51 = vpack.c.bf16 %v2496_v19, %v2493_v47 }
 0x9ab   :  { %3927 = vmatprep.subr.bf16.mxu1 %v2542_v51 }
 0x9ac   :  { %3928 = vmatpush3.bf16.msra.mxu1 %v2542_v51 }
 0x9ad   :  { %v3917_v49 = vpop.f32.mrb[88].mxu1  ;;  %3929 = vmatprep.subr.bf16.mxu1 %v2543_v56 }
 0x9ae   :  { %v2509_v32 = vpop.f32.mrb[89].mxu1 }
 0x9af   :  { %v3918_v20 = vpop.f32.mrb[90].mxu1 }
 0x9b0   :  { %v2545_v35 = vpack.c.bf16 %v3918_v20, %v3917_v49  ;;  %v2512_v53 = vpop.f32.mrb[91].mxu1  ;;  %3930 = vmatpush3.bf16.msra.mxu1 %v2543_v56 }
 0x9b1   :  { %v2544_v12 = vpack.c.bf16 %v2512_v53, %v2509_v32 }
 0x9b3   :  { %3931 = vmatprep.subr.bf16.mxu1 %v2544_v12 }
 0x9b4   :  { %3932 = vmatpush3.bf16.msra.mxu1 %v2544_v12 }
 0x9b5   :  { %v3921_v33 = vpop.f32.mrb[92].mxu1  ;;  %3933 = vmatprep.subr.bf16.mxu1 %v2545_v35 }
 0x9b6   :  { %v2525_v30 = vpop.f32.mrb[93].mxu1 }
 0x9b7   :  { %v3922_v15 = vpop.f32.mrb[94].mxu1 }
 0x9b8   :  { %v2547_v28 = vpack.c.bf16 %v3922_v15, %v3921_v33  ;;  %v2528_v24 = vpop.f32.mrb[95].mxu1  ;;  %3934 = vmatpush3.bf16.msra.mxu1 %v2545_v35 }
 0x9b9   :  { %v2546_v61 = vpack.c.bf16 %v2528_v24, %v2525_v30  ;;  %v5844_v24 = vld [vmem:[#allocation64_spill] sm:$0xff] }
 0x9bb   :  { %3935 = vmatprep.subr.bf16.mxu1 %v2546_v61 }
 0x9bc   :  { %3936 = vmatpush3.bf16.msra.mxu1 %v2546_v61 }
 0x9bd   :  { %3937 = vmatprep.subr.bf16.mxu1 %v2547_v28 }
 0x9c0   :  { %3938 = vmatpush3.bf16.msra.mxu1 %v2547_v28 }
 0x9c1   :  { %3987 = vmatprep.subr.bf16.mxu1 %v5294_v50 }
 0x9c3   :  { %3940 = vmatmul.mubr.msk.bf16.vlgmr.msra.gmra.mrb[96].mxu1 %vm4995_vm7, %v5807_v40 }
 0x9c4   :  { %3943 = vmatprep.mubr.msk.bf16.mxu1 %vm5808_vm6, %v5807_v40  ;;  %3988 = vmatpush3.bf16.msra.mxu1 %v5294_v50 }
 0x9c5   :  { %3989 = vmatprep.subr.bf16.mxu1 %v5296_v22 }
 0x9c8   :  { %3990 = vmatpush3.bf16.msra.mxu1 %v5296_v22  ;;  %v5842_v22 = vld [vmem:[#allocation62_spill] sm:$0xff] }
 0x9c9   :  { %3991 = vmatprep.subr.bf16.mxu1 %v5301_v1 }
 0x9cb   :  { %3944 = vmatmul.mubr.msk.bf16.gmra.mrb[100].mxu1 %vm5809_vm9, %v5807_v40 }
 0x9cc   :  { %3947 = vmatprep.mubr.msk.bf16.mxu1 %vm5810_vm10, %v5807_v40  ;;  %3992 = vmatpush3.bf16.msra.mxu1 %v5301_v1 }
 0x9cd   :  { %3993 = vmatprep.subr.bf16.mxu1 %v5305_v41 }
 0x9d0   :  { %3994 = vmatpush3.bf16.msra.mxu1 %v5305_v41 }
 0x9d1   :  { %3995 = vmatprep.subr.bf16.mxu1 %v5309_v59 }
 0x9d3   :  { %3948 = vmatmul.mubr.msk.bf16.gmra.mrb[104].mxu1 %vm5811_vm12, %v5807_v40 }
 0x9d4   :  { %3951 = vmatprep.mubr.msk.bf16.mxu1 %vm5812_vm0, %v5807_v40  ;;  %3996 = vmatpush3.bf16.msra.mxu1 %v5309_v59  ;;  %v5843_v59 = vld [vmem:[#allocation63_spill] sm:$0xff] }
 0x9d5   :  { %3997 = vmatprep.subr.bf16.mxu1 %v5840_v26 }
 0x9d8   :  { %3998 = vmatpush3.bf16.msra.mxu1 %v5840_v26 }
 0x9d9   :  { %3999 = vmatprep.subr.bf16.mxu1 %v5437_v37 }
 0x9db   :  { %3952 = vmatmul.mubr.msk.bf16.gmra.mrb[108].mxu1 %vm5813_vm1, %v5807_v40 }
 0x9dc   :  { %4000 = vmatpush3.bf16.msra.mxu1 %v5437_v37 }
 0x9dd   :  { %4001 = vmatprep.subr.bf16.mxu1 %v5441_v38 }
 0x9e0   :  { %4002 = vmatpush3.bf16.msra.mxu1 %v5441_v38 }
 0x9e1   :  { %4051 = vmatprep.subr.bf16.mxu1 %v5445_v45 }
 0xa96   :  { %v3941_v50 = vpop.f32.mrb[96].mxu1 }
 0xa97   :  { %v2591_v1 = vadd.f32 %v3941_v50, %v5842_v22  ;;  %v2582_v41 = vpop.f32.mrb[97].mxu1 }
 0xa98   :  { %v2583_v35 = vadd.f32 %v2582_v41, %v5843_v59  ;;  %v3942_v32 = vpop.f32.mrb[98].mxu1 }
 0xa99   :  { %v2594_v20 = vadd.f32 %v3942_v32, %v5330_v39  ;;  %v2585_v47 = vpop.f32.mrb[99].mxu1  ;;  %v2647_v19 = vmax.f32 %v2591_v1, 0.0 }
 0xa9a   :  { %v2586_v56 = vadd.f32 %v2585_v47, %v5335_v11  ;;  %v2645_v51 = vmax.f32 %v2583_v35, 0.0 }
 0xa9b   :  { %v2648_v37 = vmax.f32 %v2594_v20, 0.0 }
 0xa9c   :  { %v2646_v49 = vmax.f32 %v2586_v56, 0.0 }
 0xa9d   :  { %v2662_v53 = vpack.c.bf16 %v2648_v37, %v2647_v19 }
 0xa9e   :  { %v2661_v38 = vpack.c.bf16 %v2646_v49, %v2645_v51  ;;  %v3945_v12 = vpop.f32.mrb[100].mxu1 }
 0xa9f   :  { %v2607_v33 = vadd.f32 %v3945_v12, %v5342_v2  ;;  %v2598_v30 = vpop.f32.mrb[101].mxu1 }
 0xaa0   :  { %v2599_v15 = vadd.f32 %v2598_v30, %v5346_v54  ;;  %v3946_v28 = vpop.f32.mrb[102].mxu1  ;;  %3955 = vmatprep.subr.bf16.mxu0 %v2661_v38 }
 0xaa1   :  { %v2610_v61 = vadd.f32 %v3946_v28, %v5844_v24  ;;  %v2601_v39 = vpop.f32.mrb[103].mxu1  ;;  %3956 = vmatpush3.bf16.msra.mxu0 %v2661_v38  ;;  %v2651_v16 = vmax.f32 %v2607_v33, 0.0 }
 0xaa2   :  { %v2602_v11 = vadd.f32 %v2601_v39, %v5355_v8  ;;  %3957 = vmatprep.subr.bf16.mxu0 %v2662_v53  ;;  %v2649_v26 = vmax.f32 %v2599_v15, 0.0  ;;  %v5847_v39 = vld [vmem:[#allocation45_spill] sm:$0xff] }
 0xaa3   :  { %v2652_v17 = vmax.f32 %v2610_v61, 0.0 }
 0xaa4   :  { %v2650_v27 = vmax.f32 %v2602_v11, 0.0 }
 0xaa5   :  { %v2664_v50 = vpack.c.bf16 %v2652_v17, %v2651_v16  ;;  %3958 = vmatpush3.bf16.msra.mxu0 %v2662_v53  ;;  %v5849_v16 = vld [vmem:[#allocation43_spill] sm:$0xff] }
 0xaa6   :  { %v2663_v22 = vpack.c.bf16 %v2650_v27, %v2649_v26  ;;  %v3949_v2 = vpop.f32.mrb[104].mxu1 }
 0xaa7   :  { %v2623_v1 = vadd.f32 %v3949_v2, %v5362_v44  ;;  %v2614_v54 = vpop.f32.mrb[105].mxu1  ;;  %v5850_v2 = vld [vmem:[#allocation48_spill] sm:$0xff] }
 0xaa8   :  { %v2615_v41 = vadd.f32 %v2614_v54, %v5366_v4  ;;  %v3950_v59 = vpop.f32.mrb[106].mxu1  ;;  %3959 = vmatprep.subr.bf16.mxu0 %v2663_v22  ;;  %v5851_v54 = vld [vmem:[#allocation49_spill] sm:$0xff] }
 0xaa9   :  { %v2626_v35 = vadd.f32 %v3950_v59, %v5370_v31  ;;  %v2617_v32 = vpop.f32.mrb[107].mxu1  ;;  %3960 = vmatpush3.bf16.msra.mxu0 %v2663_v22  ;;  %v2655_v20 = vmax.f32 %v2623_v1, 0.0 }
 0xaaa   :  { %v2618_v8 = vadd.f32 %v2617_v32, %v5375_v62  ;;  %3961 = vmatprep.subr.bf16.mxu0 %v2664_v50  ;;  %v2653_v56 = vmax.f32 %v2615_v41, 0.0 }
 0xaab   :  { %v2656_v47 = vmax.f32 %v2626_v35, 0.0  ;;  %v5852_v35 = vld [vmem:[#allocation46_spill] sm:$0xff] }
 0xaac   :  { %v2654_v19 = vmax.f32 %v2618_v8, 0.0  ;;  %v5853_v8 = vld [vmem:[#allocation47_spill] sm:$0xff] }
 0xaad   :  { %v2666_v37 = vpack.c.bf16 %v2656_v47, %v2655_v20  ;;  %3962 = vmatpush3.bf16.msra.mxu0 %v2664_v50 }
 0xaae   :  { %v2665_v51 = vpack.c.bf16 %v2654_v19, %v2653_v56  ;;  %v3953_v44 = vpop.f32.mrb[108].mxu1 }
 0xaaf   :  { %v2639_v49 = vadd.f32 %v3953_v44, %v5382_v42  ;;  %v2630_v4 = vpop.f32.mrb[109].mxu1  ;;  %v5855_v44 = vld [vmem:[#allocation53_spill] sm:$0xff] }
 0xab0   :  { %v2631_v53 = vadd.f32 %v2630_v4, %v5386_v9  ;;  %v3954_v38 = vpop.f32.mrb[110].mxu1  ;;  %3963 = vmatprep.subr.bf16.mxu0 %v2665_v51 }
 0xab1   :  { %v2642_v31 = vadd.f32 %v3954_v38, %v5390_v36  ;;  %v2633_v12 = vpop.f32.mrb[111].mxu1  ;;  %3964 = vmatpush3.bf16.msra.mxu0 %v2665_v51  ;;  %v2659_v33 = vmax.f32 %v2639_v49, 0.0 }
 0xab2   :  { %v2634_v62 = vadd.f32 %v2633_v12, %v5395_v13  ;;  %3965 = vmatprep.subr.bf16.mxu0 %v2666_v37  ;;  %v2657_v15 = vmax.f32 %v2631_v53, 0.0  ;;  %v5856_v53 = vld [vmem:[#allocation50_spill] sm:$0xff] }
 0xab3   :  { %v2660_v30 = vmax.f32 %v2642_v31, 0.0  ;;  %v5857_v31 = vld [vmem:[#allocation51_spill] sm:$0xff] }
 0xab4   :  { %v2658_v28 = vmax.f32 %v2634_v62, 0.0 }
 0xab5   :  { %v2668_v24 = vpack.c.bf16 %v2660_v30, %v2659_v33  ;;  %3966 = vmatpush3.bf16.msra.mxu0 %v2666_v37  ;;  %v5854_v37 = vld [vmem:[#allocation52_spill] sm:$0xff] }
 0xab6   :  { %v2667_v61 = vpack.c.bf16 %v2658_v28, %v2657_v15 }
 0xab8   :  { %3967 = vmatprep.subr.bf16.mxu0 %v2667_v61 }
 0xab9   :  { %3968 = vmatpush3.bf16.msra.mxu0 %v2667_v61  ;;  %v5858_v61 = vld [vmem:[#allocation55_spill] sm:$0xff] }
 0xaba   :  { %3969 = vmatprep.subr.bf16.mxu0 %v2668_v24 }
 0xabd   :  { %3970 = vmatpush3.bf16.msra.mxu0 %v2668_v24 }
 0xabe   :  { %4019 = vmatprep.subr.bf16.mxu0 %v5445_v45 }
 0xac0   :  { %3972 = vmatmul.mubr.msk.bf16.vlgmr.msra.gmra.mrb[64].mxu0 %vm5062_vm3, %v5807_v40 }
 0xac1   :  { %4020 = vmatpush3.bf16.msra.mxu0 %v5445_v45  ;;  %3975 = vmatprep.mubr.msk.bf16.mxu0 %vm5066_vm11, %v5807_v40 }
 0xac2   :  { %4021 = vmatprep.subr.bf16.mxu0 %v5452_v10 }
 0xac5   :  { %4022 = vmatpush3.bf16.msra.mxu0 %v5452_v10 }
 0xac6   :  { %4023 = vmatprep.subr.bf16.mxu0 %v5458_v14 }
 0xac8   :  { %3976 = vmatmul.mubr.msk.bf16.gmra.mrb[68].mxu0 %vm5070_vm5, %v5807_v40 }
 0xac9   :  { %4024 = vmatpush3.bf16.msra.mxu0 %v5458_v14  ;;  %3979 = vmatprep.mubr.msk.bf16.mxu0 %vm5074_vm4, %v5807_v40 }
 0xaca   :  { %4025 = vmatprep.subr.bf16.mxu0 %v5464_v46 }
 0xacd   :  { %4026 = vmatpush3.bf16.msra.mxu0 %v5464_v46 }
 0xace   :  { %4027 = vmatprep.subr.bf16.mxu0 %v5470_v43 }
 0xad0   :  { %3980 = vmatmul.mubr.msk.bf16.gmra.mrb[72].mxu0 %vm5078_vm14, %v5807_v40 }
 0xad1   :  { %4028 = vmatpush3.bf16.msra.mxu0 %v5470_v43  ;;  %3983 = vmatprep.mubr.msk.bf16.mxu0 %vm5082_vm13, %v5807_v40 }
 0xad2   :  { %4029 = vmatprep.subr.bf16.mxu0 %v5476_v3 }
 0xad5   :  { %4030 = vmatpush3.bf16.msra.mxu0 %v5476_v3 }
 0xad6   :  { %4031 = vmatprep.subr.bf16.mxu0 %v5482_v58 }
 0xad8   :  { %3984 = vmatmul.mubr.msk.bf16.gmra.mrb[76].mxu0 %vm5086_vm8, %v5807_v40  ;;  %v5845_v40 = vld [vmem:[#allocation41_spill] sm:$0xff] }
 0xad9   :  { %4032 = vmatpush3.bf16.msra.mxu0 %v5482_v58  ;;  %4035 = vmatprep.mubr.bf16.mxu0 %v5506_v23 }
 0xada   :  { %4033 = vmatprep.subr.bf16.mxu0 %v5488_v34 }
 0xadd   :  { %4034 = vmatpush3.bf16.msra.mxu0 %v5488_v34 }
 0xae0   :  { %4036 = vmatmul.mubr.bf16.vlgmr.msra.gmra.mrb[80].mxu0 %v5504_v48 }
 0xae1   :  { %4039 = vmatprep.mubr.bf16.mxu0 %v5512_v52 }
 0xae8   :  { %4040 = vmatmul.mubr.bf16.gmra.mrb[84].mxu0 %v5510_v60  ;;  %v5846_v60 = vld [vmem:[#allocation44_spill] sm:$0xff] }
 0xb93   :  { %v3973_v29 = vpop.f32.mrb[64].mxu0 }
 0xb94   :  { %v2703_v55 = vpop.f32.mrb[65].mxu0  ;;  %v2768_v63 = vmul.f32 %v3973_v29, %v5145_v21  ;;  %v5859_v29 = vld [vmem:[#allocation57_spill] sm:$0xff] }
 0xb95   :  { %v3974_v57 = vpop.f32.mrb[66].mxu0  ;;  %v2766_v6 = vmul.f32 %v2703_v55, %v5136_v18 }
 0xb96   :  { %v2769_v0 = vmul.f32 %v3974_v57, %v5149_v25  ;;  %v2706_v5 = vpop.f32.mrb[67].mxu0  ;;  %v5848_v25 = vld [vmem:[#allocation42_spill] sm:$0xff] }
 0xb97   :  { %v2767_v42 = vmul.f32 %v2706_v5, %v5845_v40  ;;  %v5860_v57 = vld [vmem:[#allocation54_spill] sm:$0xff] }
 0xb98   :  { %v2783_v9 = vpack.c.bf16 %v2769_v0, %v2768_v63 }
 0xb99   :  { %v2782_v36 = vpack.c.bf16 %v2767_v42, %v2766_v6 }
 0xb9b   :  { %v3977_v13 = vpop.f32.mrb[68].mxu0  ;;  %4003 = vmatprep.mubr.bf16.mxu1 %v2782_v36 }
 0xb9c   :  { %v2719_v48 = vpop.f32.mrb[69].mxu0  ;;  %4004 = vmatmul.mubr.bf16.vlgmr.msra.gmra.mrb[112].mxu1 %v2783_v9  ;;  %v2772_v52 = vmul.f32 %v3977_v13, %v5846_v60 }
 0xb9d   :  { %v3978_v23 = vpop.f32.mrb[70].mxu0  ;;  %4059 = vmatpush3.bf16.msra.mxu1 %v5445_v45  ;;  %v2770_v18 = vmul.f32 %v2719_v48, %v5848_v25 }
 0xb9e   :  { %v2773_v21 = vmul.f32 %v3978_v23, %v5847_v39  ;;  %v2722_v11 = vpop.f32.mrb[71].mxu0  ;;  %4052 = vmatprep.subr.bf16.mxu1 %v5452_v10 }
 0xb9f   :  { %v2771_v17 = vmul.f32 %v2722_v11, %v5849_v16 }
 0xba0   :  { %v2785_v26 = vpack.c.bf16 %v2773_v21, %v2772_v52 }
 0xba1   :  { %v2784_v27 = vpack.c.bf16 %v2771_v17, %v2770_v18  ;;  %4060 = vmatpush3.bf16.msra.mxu1 %v5452_v10 }
 0xba2   :  { %4053 = vmatprep.subr.bf16.mxu1 %v5458_v14 }
 0xba3   :  { %v3981_v50 = vpop.f32.mrb[72].mxu0  ;;  %4007 = vmatprep.mubr.bf16.mxu1 %v2784_v27 }
 0xba4   :  { %v2735_v45 = vpop.f32.mrb[73].mxu0  ;;  %4008 = vmatmul.mubr.bf16.gmra.mrb[116].mxu1 %v2785_v26  ;;  %v2776_v1 = vmul.f32 %v3981_v50, %v5850_v2 }
 0xba5   :  { %v3982_v22 = vpop.f32.mrb[74].mxu0  ;;  %4061 = vmatpush3.bf16.msra.mxu1 %v5458_v14  ;;  %v2774_v32 = vmul.f32 %v2735_v45, %v5852_v35 }
 0xba6   :  { %v2777_v41 = vmul.f32 %v3982_v22, %v5851_v54  ;;  %v2738_v59 = vpop.f32.mrb[75].mxu0  ;;  %4054 = vmatprep.subr.bf16.mxu1 %v5464_v46 }
 0xba7   :  { %v2775_v10 = vmul.f32 %v2738_v59, %v5853_v8 }
 0xba8   :  { %v2787_v20 = vpack.c.bf16 %v2777_v41, %v2776_v1 }
 0xba9   :  { %v2786_v47 = vpack.c.bf16 %v2775_v10, %v2774_v32  ;;  %4062 = vmatpush3.bf16.msra.mxu1 %v5464_v46 }
 0xbaa   :  { %4055 = vmatprep.subr.bf16.mxu1 %v5470_v43 }
 0xbab   :  { %v3985_v56 = vpop.f32.mrb[76].mxu0  ;;  %4011 = vmatprep.mubr.bf16.mxu1 %v2786_v47 }
 0xbac   :  { %v2751_v14 = vpop.f32.mrb[77].mxu0  ;;  %4012 = vmatmul.mubr.bf16.gmra.mrb[120].mxu1 %v2787_v20  ;;  %v2780_v51 = vmul.f32 %v3985_v56, %v5854_v37 }
 0xbad   :  { %v3986_v19 = vpop.f32.mrb[78].mxu0  ;;  %4063 = vmatpush3.bf16.msra.mxu1 %v5470_v43  ;;  %v2778_v38 = vmul.f32 %v2751_v14, %v5856_v53 }
 0xbae   :  { %v2781_v49 = vmul.f32 %v3986_v19, %v5855_v44  ;;  %v2754_v4 = vpop.f32.mrb[79].mxu0  ;;  %4056 = vmatprep.subr.bf16.mxu1 %v5476_v3 }
 0xbaf   :  { %v2779_v46 = vmul.f32 %v2754_v4, %v5857_v31 }
 0xbb0   :  { %v2789_v12 = vpack.c.bf16 %v2781_v49, %v2780_v51 }
 0xbb1   :  { %v2788_v62 = vpack.c.bf16 %v2779_v46, %v2778_v38  ;;  %4064 = vmatpush3.bf16.msra.mxu1 %v5476_v3 }
 0xbb2   :  { %4057 = vmatprep.subr.bf16.mxu1 %v5482_v58 }
 0xbb3   :  { %4015 = vmatprep.mubr.bf16.mxu1 %v2788_v62  ;;  %v4037_v33 = vpop.f32.mrb[80].mxu0 }
 0xbb4   :  { %4016 = vmatmul.mubr.bf16.gmra.mrb[124].mxu1 %v2789_v12  ;;  %v2921_v43 = vpop.f32.mrb[81].mxu0 }
 0xbb5   :  { %4065 = vmatpush3.bf16.msra.mxu1 %v5482_v58  ;;  %v4038_v30 = vpop.f32.mrb[82].mxu0  ;;  %4043 = vmatprep.mubr.bf16.mxu1 %v5518_v7 }
 0xbb6   :  { %v2924_v15 = vpop.f32.mrb[83].mxu0  ;;  %4058 = vmatprep.subr.bf16.mxu1 %v5488_v34 }
 0xbb9   :  { %4066 = vmatpush3.bf16.msra.mxu1 %v5488_v34 }
 0xbbb   :  { %v4041_v28 = vpop.f32.mrb[84].mxu0 }
 0xbbc   :  { %v2937_v24 = vpop.f32.mrb[85].mxu0  ;;  %4044 = vmatmul.mubr.bf16.vlgmr.msra.gmra.mrb[120].mxu1 %v5858_v61 }
 0xbbd   :  { %v4042_v3 = vpop.f32.mrb[86].mxu0  ;;  %4047 = vmatprep.mubr.bf16.mxu1 %v5859_v29 }
 0xbbe   :  { %v2940_v55 = vpop.f32.mrb[87].mxu0 }
 0xbc4   :  { %4048 = vmatmul.mubr.bf16.gmra.mrb[124].mxu1 %v5860_v57 }
 0xc6f   :  { %v4005_v63 = vpop.f32.mrb[112].mxu1 }
 0xc70   :  { %v2930_v58 = vadd.f32 %v4037_v33, %v4005_v63  ;;  %v2824_v0 = vpop.f32.mrb[113].mxu1 }
 0xc71   :  { %v2922_v5 = vadd.f32 %v2921_v43, %v2824_v0  ;;  %v4006_v7 = vpop.f32.mrb[114].mxu1 }
 0xc72   :  { %v2986_v6 = vmax.f32 %v2930_v58, 0.0  ;;  %v2933_v40 = vadd.f32 %v4038_v30, %v4006_v7  ;;  %v2827_v42 = vpop.f32.mrb[115].mxu1 }
 0xc73   :  { %v2984_v9 = vmax.f32 %v2922_v5, 0.0  ;;  %v2925_v34 = vadd.f32 %v2924_v15, %v2827_v42 }
 0xc74   :  { %3002 = vst [vmem:[#allocation26 + $0x10] sm:$0xff] %v2986_v6  ;;  %v2987_v36 = vmax.f32 %v2933_v40, 0.0 }
 0xc75   :  { %3000 = vst [vmem:[#allocation26] sm:$0xff] %v2984_v9  ;;  %v2985_v13 = vmax.f32 %v2925_v34, 0.0 }
 0xc76   :  { %3003 = vst [vmem:[#allocation26 + $0x18] sm:$0xff] %v2987_v36 }
 0xc77   :  { %3001 = vst [vmem:[#allocation26 + $0x8] sm:$0xff] %v2985_v13  ;;  %v4009_v48 = vpop.f32.mrb[116].mxu1 }
 0xc78   :  { %v2946_v23 = vadd.f32 %v4041_v28, %v4009_v48  ;;  %v2840_v60 = vpop.f32.mrb[117].mxu1 }
 0xc79   :  { %v2938_v52 = vadd.f32 %v2937_v24, %v2840_v60  ;;  %v4010_v39 = vpop.f32.mrb[118].mxu1 }
 0xc7a   :  { %v2990_v21 = vmax.f32 %v2946_v23, 0.0  ;;  %v2949_v11 = vadd.f32 %v4042_v3, %v4010_v39  ;;  %v2843_v25 = vpop.f32.mrb[119].mxu1 }
 0xc7b   :  { %v2988_v18 = vmax.f32 %v2938_v52, 0.0  ;;  %v2941_v16 = vadd.f32 %v2940_v55, %v2843_v25 }
 0xc7c   :  { %3006 = vst [vmem:[#allocation26 + $0x30] sm:$0xff] %v2990_v21  ;;  %v2991_v17 = vmax.f32 %v2949_v11, 0.0 }
 0xc7d   :  { %3004 = vst [vmem:[#allocation26 + $0x20] sm:$0xff] %v2988_v18  ;;  %v2989_v26 = vmax.f32 %v2941_v16, 0.0 }
 0xc7e   :  { %3007 = vst [vmem:[#allocation26 + $0x38] sm:$0xff] %v2991_v17 }
 0xc7f   :  { %3005 = vst [vmem:[#allocation26 + $0x28] sm:$0xff] %v2989_v26 }
 0xc8f   :  { %v4045_v27 = vpop.f32.mrb[120].mxu1 }
 0xc90   :  { %v2994_v50 = vmax.f32 %v4045_v27, 0.0  ;;  %v2953_v45 = vpop.f32.mrb[121].mxu1 }
 0xc91   :  { %v2992_v22 = vmax.f32 %v2953_v45, 0.0  ;;  %v4046_v2 = vpop.f32.mrb[122].mxu1 }
 0xc92   :  { %3010 = vst [vmem:[#allocation26 + $0x50] sm:$0xff] %v2994_v50  ;;  %v2995_v1 = vmax.f32 %v4046_v2, 0.0  ;;  %v2956_v54 = vpop.f32.mrb[123].mxu1 }
 0xc93   :  { %3008 = vst [vmem:[#allocation26 + $0x40] sm:$0xff] %v2992_v22  ;;  %v2993_v41 = vmax.f32 %v2956_v54, 0.0 }
 0xc94   :  { %3011 = vst [vmem:[#allocation26 + $0x58] sm:$0xff] %v2995_v1 }
 0xc95   :  { %3009 = vst [vmem:[#allocation26 + $0x48] sm:$0xff] %v2993_v41 }
 0xc97   :  { %v4049_v59 = vpop.f32.mrb[124].mxu1 }
 0xc98   :  { %v2998_v35 = vmax.f32 %v4049_v59, 0.0  ;;  %v2969_v32 = vpop.f32.mrb[125].mxu1 }
 0xc99   :  { %v2996_v8 = vmax.f32 %v2969_v32, 0.0  ;;  %v4050_v10 = vpop.f32.mrb[126].mxu1 }
 0xc9a   :  { %3014 = vst [vmem:[#allocation26 + $0x70] sm:$0xff] %v2998_v35  ;;  %v2999_v20 = vmax.f32 %v4050_v10, 0.0  ;;  %v2972_v47 = vpop.f32.mrb[127].mxu1 }
 0xc9b   :  { %3012 = vst [vmem:[#allocation26 + $0x60] sm:$0xff] %v2996_v8  ;;  %v2997_v56 = vmax.f32 %v2972_v47, 0.0 }
 0xc9c   :  { %3015 = vst [vmem:[#allocation26 + $0x78] sm:$0xff] %v2999_v20 }
 0xc9d   :  { %3013 = vst [vmem:[#allocation26 + $0x68] sm:$0xff] %v2997_v56 }
 0xc9e   :  { %4576 = shalt.err (!%p4573_p12)
}
 0xc9f   :  { %s4577_s29 = scalar_lea.hbm %s5691_s15, 2048 }
 0xca0   :  { %p4578_p13 = scmp.ne.s32.totalorder %s5691_s15, %s4577_s29  ;;  %p4581_p0 = scmp.lt.u32.totalorder %s4577_s29, %s5691_s15 }
 0xca2   :  { %p4583_p1 = pnand %p4581_p0, %p4578_p13 }
 0xca4   :  { %4586 = shalt.err (!%p4583_p1)
}
 0xca5   :  { %3027 = dma.vmem_to_hbm [thread:$0]  %s3022_s3, 2048, %s5691_s15, [#allocation4], %s5749_s1, %s5749_s1, %s4608_s16  }
 0xca6   :  { %4603 = dma.done.wait [#allocation4], 2048  }
 0xca7   :  { %4604 = vsyncadd [#allocation4], 4294965248 }
 0xca8   :  { %3031 = vsyncpa [#allocation3], 1 }
 0xca9   :  { %3032 = vsyncpa [#allocation6], 1 }
 0xcaa   :  { %3033 = vsyncpa [#allocation9], 1 }
 0xcab   :  { %3034 = vsyncpa [#allocation12], 1 }
 0xcac   :  { %3035 = vsyncpa [#allocation15], 1 }
 0xcad   :  { %3036 = vsyncpa [#allocation18], 1 }
 0xcae   :  { %3037 = vsyncpa [#allocation21], 1 }
 0xcaf   :  { %3038 = vsyncpa [#allocation24], 1 }
 0xcb0   :  { %3039 = vsyncpa [#allocation4], 1 }

</bundles_post_ra>
